<compile_context>
chip_gen: v5e
topology: v5e:2x2
jax: 0.10.0
libtpu: 0.0.40
codegen_flags: <defaults>
</compile_context>

<pallas_src>
import functools
from typing import NamedTuple

import numpy as np
import jax
import jax.numpy as jnp
from jax.experimental import pallas as pl
from jax.experimental.pallas import tpu as pltpu  # noqa: F401  (TPU backend)


# ----------------------------------------------------------------------------
# Static dims + slab layouts (pure Python; identical in wrapper and kernel)
# ----------------------------------------------------------------------------

class Dims(NamedTuple):
    F_l: int   # ligand atom features (== number of atom types T)
    F_p: int   # pocket atom features
    H: int     # hidden features
    L: int     # latent features
    D: int     # distance bins
    B: int     # batch (number of complexes)
    N_wl: int  # whole ligand nodes
    N_wp: int  # whole pocket nodes
    N_tl: int  # traj ligand nodes
    N_tp: int  # traj pocket nodes
    d1t: int   # NextType hidden width
    d1d: int   # NextDist hidden width


def _align8(n):
    return ((n + 7) // 8) * 8


def _slab_layouts(d: Dims):
    """Static row layouts for the weight slab and the data slab."""
    T = d.F_l
    Ke = d.F_l + d.F_p + 2          # ligand feats | pocket feats | 2 bias flags

    def build(blocks):
        layout, r = {}, 0
        for name, nr, nc in blocks:
            layout[name] = (r, nr, 0, nc)
            r = _align8(r + nr)     # 8-sublane aligned block starts
        width = max(nc for _, _, nc in blocks)
        return layout, r, width

    w_blocks = [
        ("W_emb", Ke, d.H),                       # [W_l; W_p; b_l; b_p]
        ("W_ml", d.H, 2 * d.L),                   # mean | logvar fused
        ("b_ml", 1, 2 * d.L),
        ("W_lm_h", d.H, d.H),                     # latent_mlp, h part
        ("W_lm_l", d.L, d.H),                     # latent_mlp, latent part
        ("b_lm", 1, d.H),
        ("tW1", d.H, 2 * T * d.d1t),              # fused NextType (ll | lp)
        ("tb1", 1, 2 * T * d.d1t),
        ("tW2", 2 * T * d.d1t, 2 * T),            # block-diagonal
        ("tb2", 1, 2 * T),
        ("dW1", d.H, 2 * d.d1d),                  # fused NextDist (ll | lp)
        ("db1", 1, 2 * d.d1d),
        ("dW2", 2 * d.d1d, 2 * d.D),              # block-diagonal
        ("db2", 1, 2 * d.D),
    ]

    N_e = d.N_wl + d.N_wp + d.N_tl + d.N_tp + d.B
    x_blocks = [
        ("emb", N_e, Ke + 1),                     # node feats + flags + batch col
        ("dll_out", d.N_tl, d.D),
        ("dlp_out", d.N_tp, d.D),
        ("mask", d.B, 1),
        ("eps", 1, d.L),
        ("lbat_row", 1, d.N_tl),
        ("pbat_row", 1, d.N_tp),
    ]
    return build(w_blocks), build(x_blocks)


# ----------------------------------------------------------------------------
# In-kernel helpers
# ----------------------------------------------------------------------------

def _silu(x):
    return x * jax.nn.sigmoid(x)


def _log_softmax(x):
    m = jnp.max(x, axis=-1, keepdims=True)
    return x - (m + jnp.log(jnp.sum(jnp.exp(x - m), axis=-1, keepdims=True)))


def _kl_div_none(log_pred, target):
    # torch.nn.KLDivLoss(reduction='none'): target*(log(target)-log_pred), 0 if target<=0
    safe = jnp.where(target > 0, target, 1.0)
    return jnp.where(target > 0, target * (jnp.log(safe) - log_pred), 0.0)


# ----------------------------------------------------------------------------
# Fused DeepICL forward kernel (2 input slabs -> 4 loss scalars)
# ----------------------------------------------------------------------------

def _deepicl_kernel(x_ref, w_ref, o_ref, *, dims: Dims, vae_coeff: float):
    d = dims
    T = d.F_l
    Ke = d.F_l + d.F_p + 2
    (w_layout, _, _), (x_layout, _, _) = _slab_layouts(d)

    def W(name):
        r0, nr, c0, nc = w_layout[name]
        return w_ref[r0:r0 + nr, c0:c0 + nc]

    def X(name):
        r0, nr, c0, nc = x_layout[name]
        return x_ref[r0:r0 + nr, c0:c0 + nc]

    def dot(a, b):
        return jnp.dot(a, b, preferred_element_type=jnp.float32)

    # ---- ONE fused embedding matmul (whole + traj nodes + type_output rows;
    #      bias folded in via homogeneous flag columns) ----
    r_emb = x_layout["emb"][0]
    N_e = d.N_wl + d.N_wp + d.N_tl + d.N_tp + d.B
    emb = dot(x_ref[r_emb:r_emb + N_e, 0:Ke], W("W_emb"))        # (N_e, H)
    ro_wp = d.N_wl
    ro_tl = ro_wp + d.N_wp
    ro_tp = ro_tl + d.N_tl
    ro_to = ro_tp + d.N_tp
    wl_h = emb[0:ro_wp]
    wp_h = emb[ro_wp:ro_tl]
    tl_h = emb[ro_tl:ro_tp]
    tp_h0 = emb[ro_tp:ro_to]
    type_embed = emb[ro_to:ro_to + d.B]                          # l_node_emb(type_output)

    # ---- VariationalEncoder (global readout over all whole-complex nodes,
    #      exactly as the reference: h_cat.mean(dim=0) -> single latent) ----
    readout = (jnp.sum(wl_h, axis=0, keepdims=True)
               + jnp.sum(wp_h, axis=0, keepdims=True)) * (1.0 / (d.N_wl + d.N_wp))
    ml = dot(readout, W("W_ml")) + W("b_ml")                     # (1, 2L): mean | logvar
    mean = ml[:, :d.L]
    logvar = ml[:, d.L:]
    latent = X("eps") * jnp.exp(0.5 * logvar) + mean             # (1, L)
    vae_loss = vae_coeff * jnp.sum(
        -0.5 * jnp.sum(1.0 + logvar - mean * mean - jnp.exp(logvar),
                       axis=-1, keepdims=True))

    # ---- latent_mlp (non-conditional): h_p @ W_h + latent @ W_l + b ----
    tp_h = dot(tp_h0, W("W_lm_h")) + dot(latent, W("W_lm_l")) + W("b_lm")

    # ---- one-hot batch matrices, built in-kernel (iota + compare) ----
    o_tl = r_emb + ro_tl
    o_tp = r_emb + ro_tp
    lbat_col = x_ref[o_tl:o_tl + d.N_tl, Ke:Ke + 1]              # (N_tl, 1) batch ids
    pbat_col = x_ref[o_tp:o_tp + d.N_tp, Ke:Ke + 1]              # (N_tp, 1)

    def onehot_nb(col, n):                                       # (n, B) gather matrix
        lane = jax.lax.broadcasted_iota(jnp.int32, (n, d.B), 1).astype(jnp.float32)
        return (col == lane).astype(jnp.float32)

    def onehot_bn(row, n):                                       # (B, n) scatter matrix
        sub = jax.lax.broadcasted_iota(jnp.int32, (d.B, n), 0).astype(jnp.float32)
        return (row == sub).astype(jnp.float32)

    l_nb = onehot_nb(lbat_col, d.N_tl)
    p_nb = onehot_nb(pbat_col, d.N_tp)
    l_bn = onehot_bn(X("lbat_row"), d.N_tl)
    p_bn = onehot_bn(X("pbat_row"), d.N_tp)

    # ---- fused NextType heads (ligand | pocket): 2 matmuls total ----
    x_type = jnp.concatenate([tl_h, tp_h], axis=0)               # (N_tl+N_tp, H)
    zt = _silu(dot(x_type, W("tW1")) + W("tb1"))                 # (Nt, 2*T*d1t)
    tlog = dot(zt, W("tW2")) + W("tb2")                          # (Nt, 2T)
    type_out = x_ref[r_emb + ro_to:r_emb + ro_to + d.B, 0:T]     # KL target (B, T)

    def type_pred(logits, oh_bn):
        agg = dot(oh_bn, _log_softmax(logits))                   # scatter_add -> (B, T)
        return _log_softmax(agg)                                 # agg - logsumexp(agg)

    kl_ll = _kl_div_none(type_pred(tlog[:d.N_tl, 0:T], l_bn), type_out)
    kl_lp = _kl_div_none(type_pred(tlog[d.N_tl:, T:2 * T], p_bn), type_out)
    type_loss = (jnp.sum(jnp.mean(kl_ll, axis=0, keepdims=True))
                 + jnp.sum(jnp.mean(kl_lp, axis=0, keepdims=True)))

    # ---- fused NextDist heads (ligand | pocket): 2 matmuls total ----
    te_l = dot(l_nb, type_embed)                                 # type_embed[batch]
    te_p = dot(p_nb, type_embed)
    x_dist = jnp.concatenate([tl_h * te_l, tp_h * te_p], axis=0)
    zd = _silu(dot(x_dist, W("dW1")) + W("db1"))                 # (Nt, 2*d1d)
    dlog = dot(zd, W("dW2")) + W("db2")                          # (Nt, 2D)
    dll_pred = _log_softmax(dlog[:d.N_tl, 0:d.D])
    dlp_pred = _log_softmax(dlog[d.N_tl:, d.D:2 * d.D])

    mask = X("mask")                                             # (B, 1)

    def dist_sum(pred, target, oh_nb, oh_bn):
        node_mask = dot(oh_nb, mask)                             # mask[batch] -> (N, 1)
        l = _kl_div_none(pred, target) * node_mask               # (N, D)
        seg = dot(oh_bn, l)                                      # scatter_add -> (B, D)
        cnt = jnp.sum(oh_bn, axis=-1, keepdims=True)             # nodes per graph
        return jnp.sum(seg / jnp.maximum(cnt, 1.0))              # scatter_mean, summed

    dist_loss = (dist_sum(dll_pred, X("dll_out"), l_nb, l_bn)
                 + dist_sum(dlp_pred, X("dlp_out"), p_nb, p_bn)) / jnp.sum(mask)

    total_loss = vae_loss + type_loss + dist_loss

    # Lane-dense (1, 128) output block -> unmasked full-lane store.
    lane = jax.lax.broadcasted_iota(jnp.int32, (1, 128), 1)
    o_ref[...] = (jnp.where(lane == 0, total_loss, 0.0)
                  + jnp.where(lane == 1, vae_loss, 0.0)
                  + jnp.where(lane == 2, type_loss, 0.0)
                  + jnp.where(lane == 3, dist_loss, 0.0)).astype(o_ref.dtype)


# ----------------------------------------------------------------------------
# Weight packing (HOISTED: call once per parameter update, not per step)
# ----------------------------------------------------------------------------

def _block_diag(a, b):
    out = jnp.zeros((a.shape[0] + b.shape[0], a.shape[1] + b.shape[1]), a.dtype)
    out = out.at[:a.shape[0], :a.shape[1]].set(a)
    out = out.at[a.shape[0]:, a.shape[1]:].set(b)
    return out


def pack_weights(params, dims: Dims):
    d = dims
    T = d.F_l
    f32 = jnp.float32
    (w_layout, w_rows, w_width), _ = _slab_layouts(d)

    W_l = params["W_l"].astype(f32)
    b_l = params["b_l"].astype(f32)
    W_p = params["W_p"].astype(f32)
    b_p = params["b_p"].astype(f32)

    # Single embedding weight with homogeneous-coordinate bias rows.
    W_emb = jnp.concatenate([W_l, W_p, b_l[None, :], b_p[None, :]], axis=0)

    # NextType's embedding(eye(F_l)) == W_l + b_l (identity matmul removed).
    embed_type = W_l + b_l[None, :]                              # (T, H)

    def type_blocks(W1, b1, W2, b2):
        W1 = W1.astype(f32); b1 = b1.astype(f32)
        W2 = W2.astype(f32); b2 = b2.astype(f32)
        d1 = W1.shape[1]
        W1blk = jnp.einsum("th,hk->htk", embed_type, W1).reshape(d.H, T * d1)
        b1blk = jnp.tile(b1, T).reshape(1, T * d1)
        W2blk = jnp.kron(jnp.eye(T, dtype=f32), W2)              # (T*d1, T)
        b2row = jnp.broadcast_to(b2.reshape(1, 1), (1, T))
        return W1blk, b1blk, W2blk, b2row

    lW1, lb1, lW2, lb2 = type_blocks(params["tll_W1"], params["tll_b1"],
                                     params["tll_W2"], params["tll_b2"])
    pW1, pb1, pW2, pb2 = type_blocks(params["tlp_W1"], params["tlp_b1"],
                                     params["tlp_W2"], params["tlp_b2"])

    blocks = {
        "W_emb": W_emb,
        "W_ml": jnp.concatenate([params["W_mean"], params["W_logvar"]], axis=1).astype(f32),
        "b_ml": jnp.concatenate([params["b_mean"], params["b_logvar"]]).reshape(1, -1).astype(f32),
        "W_lm_h": params["W_lm"][:d.H].astype(f32),
        "W_lm_l": params["W_lm"][d.H:].astype(f32),
        "b_lm": params["b_lm"].reshape(1, -1).astype(f32),
        "tW1": jnp.concatenate([lW1, pW1], axis=1),
        "tb1": jnp.concatenate([lb1, pb1], axis=1),
        "tW2": _block_diag(lW2, pW2),
        "tb2": jnp.concatenate([lb2, pb2], axis=1),
        "dW1": jnp.concatenate([params["dll_W1"], params["dlp_W1"]], axis=1).astype(f32),
        "db1": jnp.concatenate([params["dll_b1"], params["dlp_b1"]]).reshape(1, -1).astype(f32),
        "dW2": _block_diag(params["dll_W2"].astype(f32), params["dlp_W2"].astype(f32)),
        "db2": jnp.concatenate([params["dll_b2"], params["dlp_b2"]]).reshape(1, -1).astype(f32),
    }
    slab = jnp.zeros((w_rows, w_width), f32)
    for name, blk in blocks.items():
        r0, nr, c0, nc = w_layout[name]
        assert blk.shape == (nr, nc), (name, blk.shape, (nr, nc))
        slab = jax.lax.dynamic_update_slice(slab, blk, (r0, c0))
    return slab


# ----------------------------------------------------------------------------
# Data packing + forward wrapper (one pallas_call, two input DMAs)
# ----------------------------------------------------------------------------

def _pack_data(whole, traj, eps, dims: Dims):
    d = dims
    f32 = jnp.float32
    Ke = d.F_l + d.F_p + 2
    _, (x_layout, x_rows, x_width) = _slab_layouts(d)
    lig_flag, poc_flag = d.F_l + d.F_p, d.F_l + d.F_p + 1

    def node_rows(feats, col0, flag_col, batch=None):
        n = feats.shape[0]
        blk = jnp.zeros((n, Ke + 1), f32)
        blk = blk.at[:, col0:col0 + feats.shape[1]].set(feats.astype(f32))
        blk = blk.at[:, flag_col].set(1.0)
        if batch is not None:
            blk = blk.at[:, Ke].set(batch.astype(f32))
        return blk

    emb = jnp.concatenate([
        node_rows(whole["ligand_x"], 0, lig_flag),
        node_rows(whole["pocket_x"], d.F_l, poc_flag),
        node_rows(traj["ligand_x"], 0, lig_flag, traj["ligand_batch"]),
        node_rows(traj["pocket_x"], d.F_l, poc_flag, traj["pocket_batch"]),
        node_rows(traj["type_output"], 0, lig_flag),
    ], axis=0)

    blocks = {
        "emb": emb,
        "dll_out": traj["dist_ll_output"].astype(f32),
        "dlp_out": traj["dist_lp_output"].astype(f32),
        "mask": traj["mask"].astype(f32).reshape(d.B, 1),
        "eps": eps.astype(f32).reshape(1, d.L),
        "lbat_row": traj["ligand_batch"].astype(f32).reshape(1, d.N_tl),
        "pbat_row": traj["pocket_batch"].astype(f32).reshape(1, d.N_tp),
    }
    slab = jnp.zeros((x_rows, x_width), f32)
    for name, blk in blocks.items():
        r0, nr, c0, nc = x_layout[name]
        slab = jax.lax.dynamic_update_slice(slab, blk, (r0, c0))
    return slab


@functools.partial(jax.jit, static_argnames=("dims", "vae_coeff"))
def deepicl_forward(w_slab, whole, traj, eps_key, *, dims: Dims, vae_coeff: float):
    eps = jax.random.normal(eps_key, (1, dims.L), jnp.float32)   # reparameterization
    x_slab = _pack_data(whole, traj, eps, dims)
    out = pl.pallas_call(
        functools.partial(_deepicl_kernel, dims=dims, vae_coeff=float(vae_coeff)),
        out_shape=jax.ShapeDtypeStruct((1, 128), jnp.float32),
    )(x_slab, w_slab)
    return out[0, 0], out[0, 1], out[0, 2], out[0, 3], None


# ----------------------------------------------------------------------------
# Parameter init (matches torch.nn.Linear default init layout: W is [in, out])
# ----------------------------------------------------------------------------

def init_linear(key, fan_in, fan_out, bias=True):
    k1, k2 = jax.random.split(key)
    bound = 1.0 / float(np.sqrt(fan_in))
    w = jax.random.uniform(k1, (fan_in, fan_out), jnp.float32, -bound, bound)
    b = jax.random.uniform(k2, (fan_out,), jnp.float32, -bound, bound) if bias else None
    return w, b


def init_params(key, F_l, F_p, H, L, type_dims, dist_dims):
    ks = iter(jax.random.split(key, 16))
    p = {}
    p["W_l"], p["b_l"] = init_linear(next(ks), F_l, H)          # shared l_node_emb
    p["W_p"], p["b_p"] = init_linear(next(ks), F_p, H)
    p["W_mean"], p["b_mean"] = init_linear(next(ks), H, L)
    p["W_logvar"], p["b_logvar"] = init_linear(next(ks), H, L)
    p["W_lm"], p["b_lm"] = init_linear(next(ks), H + L, H)      # latent_mlp (non-cond)
    for name, dims_ in (("tll", type_dims), ("tlp", type_dims),
                        ("dll", dist_dims), ("dlp", dist_dims)):
        p[name + "_W1"], p[name + "_b1"] = init_linear(next(ks), int(dims_[0]), int(dims_[1]))
        p[name + "_W2"], p[name + "_b2"] = init_linear(next(ks), int(dims_[1]), int(dims_[2]))
    return p


# ----------------------------------------------------------------------------
# main
# ----------------------------------------------------------------------------

if __name__ == "__main__":
    F_l, F_p, H, L = 10, 12, 32, 16          # ligand/pocket atom feats, hidden, latent
    num_dense_layers = 2                      # heads specialized to 2 dense layers
    dist_one_hot_param2 = (0.0, 5.0, 25)
    D = int(dist_one_hot_param2[-1])          # 25 distance bins
    B = 2
    vae_coeff = 1.0

    type_dims = [int(v) for v in np.linspace(H, 1, num_dense_layers + 1)]   # [32, 16, 1]
    dist_dims = [int(v) for v in np.linspace(H, D, num_dense_layers + 1)]   # [32, 28, 25]

    key = jax.random.PRNGKey(0)
    kp, kd, keps = jax.random.split(key, 3)
    params = init_params(kp, F_l, F_p, H, L, type_dims, dist_dims)

    dk = iter(jax.random.split(kd, 8))
    whole = {
        "ligand_x": jax.random.normal(next(dk), (12, F_l), jnp.float32),
        "pocket_x": jax.random.normal(next(dk), (20, F_p), jnp.float32),
    }
    traj = {
        "ligand_x": jax.random.normal(next(dk), (10, F_l), jnp.float32),
        "pocket_x": jax.random.normal(next(dk), (16, F_p), jnp.float32),
        "ligand_batch": jnp.array([0] * 5 + [1] * 5, jnp.int32),
        "pocket_batch": jnp.array([0] * 8 + [1] * 8, jnp.int32),
        "type_output": jax.nn.softmax(jax.random.normal(next(dk), (B, F_l)), axis=-1),
        "dist_ll_output": jax.nn.softmax(jax.random.normal(next(dk), (10, D)), axis=-1),
        "dist_lp_output": jax.nn.softmax(jax.random.normal(next(dk), (16, D)), axis=-1),
        "mask": jnp.ones((B,), jnp.float32),
    }

    dims = Dims(F_l=F_l, F_p=F_p, H=H, L=L, D=D, B=B,
                N_wl=int(whole["ligand_x"].shape[0]),
                N_wp=int(whole["pocket_x"].shape[0]),
                N_tl=int(traj["ligand_x"].shape[0]),
                N_tp=int(traj["pocket_x"].shape[0]),
                d1t=int(type_dims[1]), d1d=int(dist_dims[1]))

    # Weight-only preprocessing: done ONCE (hoisted out of the per-step path).
    w_slab = jax.block_until_ready(pack_weights(params, dims))

    out = deepicl_forward(w_slab, whole, traj, keps, dims=dims, vae_coeff=vae_coeff)
    jax.block_until_ready(out[:4])
    print("KERNEL_OK")
</pallas_src>

<mosaic_0001>
module attributes {stable_mosaic.version = 11 : i64} {
  func.func @_deepicl_kernel(%arg0: memref<128x25xf32, #tpu.memory_space<vmem>>, %arg1: memref<592x320xf32, #tpu.memory_space<vmem>>, %arg2: memref<1x128xf32, #tpu.memory_space<vmem>>) attributes {dimension_semantics = [], scalar_prefetch = 0 : i64, scratch_operands = 0 : i64, tpu.core_type = #tpu.core_type<tc>} {
    %c0 = arith.constant 0 : index
    %c0_0 = arith.constant 0 : index
    %0 = vector.load %arg0[%c0, %c0_0] : memref<128x25xf32, #tpu.memory_space<vmem>>, vector<60x24xf32>
    %c0_1 = arith.constant 0 : index
    %c0_2 = arith.constant 0 : index
    %1 = vector.load %arg1[%c0_1, %c0_2] : memref<592x320xf32, #tpu.memory_space<vmem>>, vector<24x32xf32>
    %cst = arith.constant dense<0.000000e+00> : vector<60x32xf32>
    %2 = tpu.matmul %0, %1, %cst {dimension_numbers = #tpu.dot_dimension_numbers<[1], [0], [0], [1], [0, 0, 1, 1], [], []>} : vector<60x24xf32>, vector<24x32xf32>, vector<60x32xf32> -> vector<60x32xf32>
    %3 = vector.extract_strided_slice %2 {offsets = [0, 0], sizes = [12, 32], strides = [1, 1]} : vector<60x32xf32> to vector<12x32xf32>
    %4 = vector.extract_strided_slice %2 {offsets = [12, 0], sizes = [20, 32], strides = [1, 1]} : vector<60x32xf32> to vector<20x32xf32>
    %5 = vector.extract_strided_slice %2 {offsets = [32, 0], sizes = [10, 32], strides = [1, 1]} : vector<60x32xf32> to vector<10x32xf32>
    %6 = vector.extract_strided_slice %2 {offsets = [42, 0], sizes = [16, 32], strides = [1, 1]} : vector<60x32xf32> to vector<16x32xf32>
    %7 = vector.extract_strided_slice %2 {offsets = [58, 0], sizes = [2, 32], strides = [1, 1]} : vector<60x32xf32> to vector<2x32xf32>
    %cst_3 = arith.constant dense<0.000000e+00> : vector<32xf32>
    %8 = vector.multi_reduction <add>, %3, %cst_3 [0] : vector<12x32xf32> to vector<32xf32>
    %9 = vector.shape_cast %8 : vector<32xf32> to vector<1x32xf32>
    %cst_4 = arith.constant dense<0.000000e+00> : vector<32xf32>
    %10 = vector.multi_reduction <add>, %4, %cst_4 [0] : vector<20x32xf32> to vector<32xf32>
    %11 = vector.shape_cast %10 : vector<32xf32> to vector<1x32xf32>
    %12 = arith.addf %9, %11 : vector<1x32xf32>
    %cst_5 = arith.constant 3.125000e-02 : f32
    %13 = vector.broadcast %cst_5 : f32 to vector<1x32xf32>
    %14 = arith.mulf %12, %13 : vector<1x32xf32>
    %c24 = arith.constant 24 : index
    %c0_6 = arith.constant 0 : index
    %15 = vector.load %arg1[%c24, %c0_6] : memref<592x320xf32, #tpu.memory_space<vmem>>, vector<32x32xf32>
    %cst_7 = arith.constant dense<0.000000e+00> : vector<1x32xf32>
    %16 = tpu.matmul %14, %15, %cst_7 {dimension_numbers = #tpu.dot_dimension_numbers<[1], [0], [0], [1], [0, 0, 1, 1], [], []>} : vector<1x32xf32>, vector<32x32xf32>, vector<1x32xf32> -> vector<1x32xf32>
    %c56 = arith.constant 56 : index
    %c0_8 = arith.constant 0 : index
    %17 = vector.load %arg1[%c56, %c0_8] : memref<592x320xf32, #tpu.memory_space<vmem>>, vector<1x32xf32>
    %18 = arith.addf %16, %17 : vector<1x32xf32>
    %19 = vector.extract_strided_slice %18 {offsets = [0, 0], sizes = [1, 16], strides = [1, 1]} : vector<1x32xf32> to vector<1x16xf32>
    %20 = vector.extract_strided_slice %18 {offsets = [0, 16], sizes = [1, 16], strides = [1, 1]} : vector<1x32xf32> to vector<1x16xf32>
    %c104 = arith.constant 104 : index
    %c0_9 = arith.constant 0 : index
    %21 = vector.load %arg0[%c104, %c0_9] : memref<128x25xf32, #tpu.memory_space<vmem>>, vector<1x16xf32>
    %cst_10 = arith.constant 5.000000e-01 : f32
    %22 = vector.broadcast %cst_10 : f32 to vector<1x16xf32>
    %23 = arith.mulf %22, %20 : vector<1x16xf32>
    %24 = math.exp %23 : vector<1x16xf32>
    %25 = arith.mulf %21, %24 : vector<1x16xf32>
    %26 = arith.addf %25, %19 : vector<1x16xf32>
    %cst_11 = arith.constant 1.000000e+00 : f32
    %27 = vector.broadcast %cst_11 : f32 to vector<1x16xf32>
    %28 = arith.addf %27, %20 : vector<1x16xf32>
    %29 = arith.mulf %19, %19 : vector<1x16xf32>
    %30 = arith.subf %28, %29 : vector<1x16xf32>
    %31 = math.exp %20 : vector<1x16xf32>
    %32 = arith.subf %30, %31 : vector<1x16xf32>
    %cst_12 = arith.constant dense<0.000000e+00> : vector<1xf32>
    %33 = vector.multi_reduction <add>, %32, %cst_12 [1] : vector<1x16xf32> to vector<1xf32>
    %34 = vector.shape_cast %33 : vector<1xf32> to vector<1x1xf32>
    %cst_13 = arith.constant -5.000000e-01 : f32
    %35 = vector.broadcast %cst_13 : f32 to vector<1x1xf32>
    %36 = arith.mulf %35, %34 : vector<1x1xf32>
    %37 = vector.shape_cast %36 : vector<1x1xf32> to vector<1x1x1xf32>
    %cst_14 = arith.constant dense<0.000000e+00> : vector<1xf32>
    %38 = vector.multi_reduction <add>, %37, %cst_14 [1, 2] : vector<1x1x1xf32> to vector<1xf32>
    %39 = vector.shape_cast %38 : vector<1xf32> to vector<1x1x1xf32>
    %40 = vector.extract %39[0, 0, 0] : f32 from vector<1x1x1xf32>
    %cst_15 = arith.constant 1.000000e+00 : f32
    %41 = arith.mulf %cst_15, %40 : f32
    %c64 = arith.constant 64 : index
    %c0_16 = arith.constant 0 : index
    %42 = vector.load %arg1[%c64, %c0_16] : memref<592x320xf32, #tpu.memory_space<vmem>>, vector<32x32xf32>
    %cst_17 = arith.constant dense<0.000000e+00> : vector<16x32xf32>
    %43 = tpu.matmul %6, %42, %cst_17 {dimension_numbers = #tpu.dot_dimension_numbers<[1], [0], [0], [1], [0, 0, 1, 1], [], []>} : vector<16x32xf32>, vector<32x32xf32>, vector<16x32xf32> -> vector<16x32xf32>
    %c96 = arith.constant 96 : index
    %c0_18 = arith.constant 0 : index
    %44 = vector.load %arg1[%c96, %c0_18] : memref<592x320xf32, #tpu.memory_space<vmem>>, vector<16x32xf32>
    %cst_19 = arith.constant dense<0.000000e+00> : vector<1x32xf32>
    %45 = tpu.matmul %26, %44, %cst_19 {dimension_numbers = #tpu.dot_dimension_numbers<[1], [0], [0], [1], [0, 0, 1, 1], [], []>} : vector<1x16xf32>, vector<16x32xf32>, vector<1x32xf32> -> vector<1x32xf32>
    %46 = vector.broadcast %45 : vector<1x32xf32> to vector<16x32xf32>
    %47 = arith.addf %43, %46 : vector<16x32xf32>
    %c112 = arith.constant 112 : index
    %c0_20 = arith.constant 0 : index
    %48 = vector.load %arg1[%c112, %c0_20] : memref<592x320xf32, #tpu.memory_space<vmem>>, vector<1x32xf32>
    %49 = vector.broadcast %48 : vector<1x32xf32> to vector<16x32xf32>
    %50 = arith.addf %47, %49 : vector<16x32xf32>
    %c32 = arith.constant 32 : index
    %c24_21 = arith.constant 24 : index
    %51 = vector.load %arg0[%c32, %c24_21] : memref<128x25xf32, #tpu.memory_space<vmem>>, vector<10x1xf32>
    %c42 = arith.constant 42 : index
    %c24_22 = arith.constant 24 : index
    %52 = vector.load %arg0[%c42, %c24_22] : memref<128x25xf32, #tpu.memory_space<vmem>>, vector<16x1xf32>
    %53 = tpu.iota {dimensions = array<i32: 1>} : vector<10x2xi32>
    %54 = arith.sitofp %53 : vector<10x2xi32> to vector<10x2xf32>
    %55 = vector.broadcast %51 : vector<10x1xf32> to vector<10x2xf32>
    %56 = arith.cmpf oeq, %55, %54 : vector<10x2xf32>
    %57 = arith.extui %56 : vector<10x2xi1> to vector<10x2xi32>
    %58 = arith.sitofp %57 : vector<10x2xi32> to vector<10x2xf32>
    %59 = tpu.iota {dimensions = array<i32: 1>} : vector<16x2xi32>
    %60 = arith.sitofp %59 : vector<16x2xi32> to vector<16x2xf32>
    %61 = vector.broadcast %52 : vector<16x1xf32> to vector<16x2xf32>
    %62 = arith.cmpf oeq, %61, %60 : vector<16x2xf32>
    %63 = arith.extui %62 : vector<16x2xi1> to vector<16x2xi32>
    %64 = arith.sitofp %63 : vector<16x2xi32> to vector<16x2xf32>
    %c112_23 = arith.constant 112 : index
    %c0_24 = arith.constant 0 : index
    %65 = vector.load %arg0[%c112_23, %c0_24] : memref<128x25xf32, #tpu.memory_space<vmem>>, vector<1x10xf32>
    %66 = tpu.iota {dimensions = array<i32: 0>} : vector<2x10xi32>
    %67 = arith.sitofp %66 : vector<2x10xi32> to vector<2x10xf32>
    %68 = vector.broadcast %65 : vector<1x10xf32> to vector<2x10xf32>
    %69 = arith.cmpf oeq, %68, %67 : vector<2x10xf32>
    %70 = arith.extui %69 : vector<2x10xi1> to vector<2x10xi32>
    %71 = arith.sitofp %70 : vector<2x10xi32> to vector<2x10xf32>
    %c120 = arith.constant 120 : index
    %c0_25 = arith.constant 0 : index
    %72 = vector.load %arg0[%c120, %c0_25] : memref<128x25xf32, #tpu.memory_space<vmem>>, vector<1x16xf32>
    %73 = tpu.iota {dimensions = array<i32: 0>} : vector<2x16xi32>
    %74 = arith.sitofp %73 : vector<2x16xi32> to vector<2x16xf32>
    %75 = vector.broadcast %72 : vector<1x16xf32> to vector<2x16xf32>
    %76 = arith.cmpf oeq, %75, %74 : vector<2x16xf32>
    %77 = arith.extui %76 : vector<2x16xi1> to vector<2x16xi32>
    %78 = arith.sitofp %77 : vector<2x16xi32> to vector<2x16xf32>
    %79 = tpu.concatenate %5, %50 in 0 : vector<10x32xf32>, vector<16x32xf32> -> vector<26x32xf32>
    %c120_26 = arith.constant 120 : index
    %c0_27 = arith.constant 0 : index
    %80 = vector.load %arg1[%c120_26, %c0_27] : memref<592x320xf32, #tpu.memory_space<vmem>>, vector<32x320xf32>
    %cst_28 = arith.constant dense<0.000000e+00> : vector<26x320xf32>
    %81 = tpu.matmul %79, %80, %cst_28 {dimension_numbers = #tpu.dot_dimension_numbers<[1], [0], [0], [1], [0, 0, 1, 1], [], []>} : vector<26x32xf32>, vector<32x320xf32>, vector<26x320xf32> -> vector<26x320xf32>
    %c152 = arith.constant 152 : index
    %c0_29 = arith.constant 0 : index
    %82 = vector.load %arg1[%c152, %c0_29] : memref<592x320xf32, #tpu.memory_space<vmem>>, vector<1x320xf32>
    %83 = vector.broadcast %82 : vector<1x320xf32> to vector<26x320xf32>
    %84 = arith.addf %81, %83 : vector<26x320xf32>
    %85 = arith.negf %84 : vector<26x320xf32>
    %86 = math.exp %85 : vector<26x320xf32>
    %cst_30 = arith.constant 1.000000e+00 : f32
    %87 = vector.broadcast %cst_30 : f32 to vector<26x320xf32>
    %88 = arith.addf %87, %86 : vector<26x320xf32>
    %89 = arith.divf %87, %88 : vector<26x320xf32>
    %90 = arith.mulf %84, %89 : vector<26x320xf32>
    %c160 = arith.constant 160 : index
    %c0_31 = arith.constant 0 : index
    %91 = vector.load %arg1[%c160, %c0_31] : memref<592x320xf32, #tpu.memory_space<vmem>>, vector<320x20xf32>
    %cst_32 = arith.constant dense<0.000000e+00> : vector<26x20xf32>
    %92 = tpu.matmul %90, %91, %cst_32 {dimension_numbers = #tpu.dot_dimension_numbers<[1], [0], [0], [1], [0, 0, 1, 1], [], []>} : vector<26x320xf32>, vector<320x20xf32>, vector<26x20xf32> -> vector<26x20xf32>
    %c480 = arith.constant 480 : index
    %c0_33 = arith.constant 0 : index
    %93 = vector.load %arg1[%c480, %c0_33] : memref<592x320xf32, #tpu.memory_space<vmem>>, vector<1x20xf32>
    %94 = vector.broadcast %93 : vector<1x20xf32> to vector<26x20xf32>
    %95 = arith.addf %92, %94 : vector<26x20xf32>
    %c58 = arith.constant 58 : index
    %c0_34 = arith.constant 0 : index
    %96 = vector.load %arg0[%c58, %c0_34] : memref<128x25xf32, #tpu.memory_space<vmem>>, vector<2x10xf32>
    %97 = vector.extract_strided_slice %95 {offsets = [0, 0], sizes = [10, 10], strides = [1, 1]} : vector<26x20xf32> to vector<10x10xf32>
    %cst_35 = arith.constant dense<0xFF800000> : vector<10xf32>
    %98 = vector.multi_reduction <maximumf>, %97, %cst_35 [1] : vector<10x10xf32> to vector<10xf32>
    %99 = vector.shape_cast %98 : vector<10xf32> to vector<10x1xf32>
    %100 = vector.broadcast %99 : vector<10x1xf32> to vector<10x10xf32>
    %101 = arith.subf %97, %100 : vector<10x10xf32>
    %102 = math.exp %101 : vector<10x10xf32>
    %cst_36 = arith.constant dense<0.000000e+00> : vector<10xf32>
    %103 = vector.multi_reduction <add>, %102, %cst_36 [1] : vector<10x10xf32> to vector<10xf32>
    %104 = vector.shape_cast %103 : vector<10xf32> to vector<10x1xf32>
    %105 = math.log %104 : vector<10x1xf32>
    %106 = arith.addf %99, %105 : vector<10x1xf32>
    %107 = vector.broadcast %106 : vector<10x1xf32> to vector<10x10xf32>
    %108 = arith.subf %97, %107 : vector<10x10xf32>
    %cst_37 = arith.constant dense<0.000000e+00> : vector<2x10xf32>
    %109 = tpu.matmul %71, %108, %cst_37 {dimension_numbers = #tpu.dot_dimension_numbers<[1], [0], [0], [1], [0, 0, 1, 1], [], []>} : vector<2x10xf32>, vector<10x10xf32>, vector<2x10xf32> -> vector<2x10xf32>
    %cst_38 = arith.constant dense<0xFF800000> : vector<2xf32>
    %110 = vector.multi_reduction <maximumf>, %109, %cst_38 [1] : vector<2x10xf32> to vector<2xf32>
    %111 = vector.shape_cast %110 : vector<2xf32> to vector<2x1xf32>
    %112 = vector.broadcast %111 : vector<2x1xf32> to vector<2x10xf32>
    %113 = arith.subf %109, %112 : vector<2x10xf32>
    %114 = math.exp %113 : vector<2x10xf32>
    %cst_39 = arith.constant dense<0.000000e+00> : vector<2xf32>
    %115 = vector.multi_reduction <add>, %114, %cst_39 [1] : vector<2x10xf32> to vector<2xf32>
    %116 = vector.shape_cast %115 : vector<2xf32> to vector<2x1xf32>
    %117 = math.log %116 : vector<2x1xf32>
    %118 = arith.addf %111, %117 : vector<2x1xf32>
    %119 = vector.broadcast %118 : vector<2x1xf32> to vector<2x10xf32>
    %120 = arith.subf %109, %119 : vector<2x10xf32>
    %cst_40 = arith.constant 0.000000e+00 : f32
    %121 = vector.broadcast %cst_40 : f32 to vector<2x10xf32>
    %122 = arith.cmpf ogt, %96, %121 : vector<2x10xf32>
    %cst_41 = arith.constant 1.000000e+00 : f32
    %123 = vector.broadcast %cst_41 : f32 to vector<2x10xf32>
    %124 = arith.select %122, %96, %123 : vector<2x10xi1>, vector<2x10xf32>
    %cst_42 = arith.constant 0.000000e+00 : f32
    %125 = vector.broadcast %cst_42 : f32 to vector<2x10xf32>
    %126 = arith.cmpf ogt, %96, %125 : vector<2x10xf32>
    %127 = math.log %124 : vector<2x10xf32>
    %128 = arith.subf %127, %120 : vector<2x10xf32>
    %129 = arith.mulf %96, %128 : vector<2x10xf32>
    %cst_43 = arith.constant 0.000000e+00 : f32
    %130 = vector.broadcast %cst_43 : f32 to vector<2x10xf32>
    %131 = arith.select %126, %129, %130 : vector<2x10xi1>, vector<2x10xf32>
    %132 = vector.extract_strided_slice %95 {offsets = [10, 10], sizes = [16, 10], strides = [1, 1]} : vector<26x20xf32> to vector<16x10xf32>
    %cst_44 = arith.constant dense<0xFF800000> : vector<16xf32>
    %133 = vector.multi_reduction <maximumf>, %132, %cst_44 [1] : vector<16x10xf32> to vector<16xf32>
    %134 = vector.shape_cast %133 : vector<16xf32> to vector<16x1xf32>
    %135 = vector.broadcast %134 : vector<16x1xf32> to vector<16x10xf32>
    %136 = arith.subf %132, %135 : vector<16x10xf32>
    %137 = math.exp %136 : vector<16x10xf32>
    %cst_45 = arith.constant dense<0.000000e+00> : vector<16xf32>
    %138 = vector.multi_reduction <add>, %137, %cst_45 [1] : vector<16x10xf32> to vector<16xf32>
    %139 = vector.shape_cast %138 : vector<16xf32> to vector<16x1xf32>
    %140 = math.log %139 : vector<16x1xf32>
    %141 = arith.addf %134, %140 : vector<16x1xf32>
    %142 = vector.broadcast %141 : vector<16x1xf32> to vector<16x10xf32>
    %143 = arith.subf %132, %142 : vector<16x10xf32>
    %cst_46 = arith.constant dense<0.000000e+00> : vector<2x10xf32>
    %144 = tpu.matmul %78, %143, %cst_46 {dimension_numbers = #tpu.dot_dimension_numbers<[1], [0], [0], [1], [0, 0, 1, 1], [], []>} : vector<2x16xf32>, vector<16x10xf32>, vector<2x10xf32> -> vector<2x10xf32>
    %cst_47 = arith.constant dense<0xFF800000> : vector<2xf32>
    %145 = vector.multi_reduction <maximumf>, %144, %cst_47 [1] : vector<2x10xf32> to vector<2xf32>
    %146 = vector.shape_cast %145 : vector<2xf32> to vector<2x1xf32>
    %147 = vector.broadcast %146 : vector<2x1xf32> to vector<2x10xf32>
    %148 = arith.subf %144, %147 : vector<2x10xf32>
    %149 = math.exp %148 : vector<2x10xf32>
    %cst_48 = arith.constant dense<0.000000e+00> : vector<2xf32>
    %150 = vector.multi_reduction <add>, %149, %cst_48 [1] : vector<2x10xf32> to vector<2xf32>
    %151 = vector.shape_cast %150 : vector<2xf32> to vector<2x1xf32>
    %152 = math.log %151 : vector<2x1xf32>
    %153 = arith.addf %146, %152 : vector<2x1xf32>
    %154 = vector.broadcast %153 : vector<2x1xf32> to vector<2x10xf32>
    %155 = arith.subf %144, %154 : vector<2x10xf32>
    %cst_49 = arith.constant 0.000000e+00 : f32
    %156 = vector.broadcast %cst_49 : f32 to vector<2x10xf32>
    %157 = arith.cmpf ogt, %96, %156 : vector<2x10xf32>
    %cst_50 = arith.constant 1.000000e+00 : f32
    %158 = vector.broadcast %cst_50 : f32 to vector<2x10xf32>
    %159 = arith.select %157, %96, %158 : vector<2x10xi1>, vector<2x10xf32>
    %cst_51 = arith.constant 0.000000e+00 : f32
    %160 = vector.broadcast %cst_51 : f32 to vector<2x10xf32>
    %161 = arith.cmpf ogt, %96, %160 : vector<2x10xf32>
    %162 = math.log %159 : vector<2x10xf32>
    %163 = arith.subf %162, %155 : vector<2x10xf32>
    %164 = arith.mulf %96, %163 : vector<2x10xf32>
    %cst_52 = arith.constant 0.000000e+00 : f32
    %165 = vector.broadcast %cst_52 : f32 to vector<2x10xf32>
    %166 = arith.select %161, %164, %165 : vector<2x10xi1>, vector<2x10xf32>
    %cst_53 = arith.constant dense<0.000000e+00> : vector<10xf32>
    %167 = vector.multi_reduction <add>, %131, %cst_53 [0] : vector<2x10xf32> to vector<10xf32>
    %168 = vector.shape_cast %167 : vector<10xf32> to vector<1x10xf32>
    %cst_54 = arith.constant 2.000000e+00 : f32
    %169 = vector.broadcast %cst_54 : f32 to vector<1x10xf32>
    %170 = arith.divf %168, %169 : vector<1x10xf32>
    %171 = vector.shape_cast %170 : vector<1x10xf32> to vector<1x1x10xf32>
    %cst_55 = arith.constant dense<0.000000e+00> : vector<1xf32>
    %172 = vector.multi_reduction <add>, %171, %cst_55 [1, 2] : vector<1x1x10xf32> to vector<1xf32>
    %173 = vector.shape_cast %172 : vector<1xf32> to vector<1x1x1xf32>
    %174 = vector.extract %173[0, 0, 0] : f32 from vector<1x1x1xf32>
    %cst_56 = arith.constant dense<0.000000e+00> : vector<10xf32>
    %175 = vector.multi_reduction <add>, %166, %cst_56 [0] : vector<2x10xf32> to vector<10xf32>
    %176 = vector.shape_cast %175 : vector<10xf32> to vector<1x10xf32>
    %cst_57 = arith.constant 2.000000e+00 : f32
    %177 = vector.broadcast %cst_57 : f32 to vector<1x10xf32>
    %178 = arith.divf %176, %177 : vector<1x10xf32>
    %179 = vector.shape_cast %178 : vector<1x10xf32> to vector<1x1x10xf32>
    %cst_58 = arith.constant dense<0.000000e+00> : vector<1xf32>
    %180 = vector.multi_reduction <add>, %179, %cst_58 [1, 2] : vector<1x1x10xf32> to vector<1xf32>
    %181 = vector.shape_cast %180 : vector<1xf32> to vector<1x1x1xf32>
    %182 = vector.extract %181[0, 0, 0] : f32 from vector<1x1x1xf32>
    %183 = arith.addf %174, %182 : f32
    %cst_59 = arith.constant dense<0.000000e+00> : vector<10x32xf32>
    %184 = tpu.matmul %58, %7, %cst_59 {dimension_numbers = #tpu.dot_dimension_numbers<[1], [0], [0], [1], [0, 0, 1, 1], [], []>} : vector<10x2xf32>, vector<2x32xf32>, vector<10x32xf32> -> vector<10x32xf32>
    %cst_60 = arith.constant dense<0.000000e+00> : vector<16x32xf32>
    %185 = tpu.matmul %64, %7, %cst_60 {dimension_numbers = #tpu.dot_dimension_numbers<[1], [0], [0], [1], [0, 0, 1, 1], [], []>} : vector<16x2xf32>, vector<2x32xf32>, vector<16x32xf32> -> vector<16x32xf32>
    %186 = arith.mulf %5, %184 : vector<10x32xf32>
    %187 = arith.mulf %50, %185 : vector<16x32xf32>
    %188 = tpu.concatenate %186, %187 in 0 : vector<10x32xf32>, vector<16x32xf32> -> vector<26x32xf32>
    %c488 = arith.constant 488 : index
    %c0_61 = arith.constant 0 : index
    %189 = vector.load %arg1[%c488, %c0_61] : memref<592x320xf32, #tpu.memory_space<vmem>>, vector<32x56xf32>
    %cst_62 = arith.constant dense<0.000000e+00> : vector<26x56xf32>
    %190 = tpu.matmul %188, %189, %cst_62 {dimension_numbers = #tpu.dot_dimension_numbers<[1], [0], [0], [1], [0, 0, 1, 1], [], []>} : vector<26x32xf32>, vector<32x56xf32>, vector<26x56xf32> -> vector<26x56xf32>
    %c520 = arith.constant 520 : index
    %c0_63 = arith.constant 0 : index
    %191 = vector.load %arg1[%c520, %c0_63] : memref<592x320xf32, #tpu.memory_space<vmem>>, vector<1x56xf32>
    %192 = vector.broadcast %191 : vector<1x56xf32> to vector<26x56xf32>
    %193 = arith.addf %190, %192 : vector<26x56xf32>
    %194 = arith.negf %193 : vector<26x56xf32>
    %195 = math.exp %194 : vector<26x56xf32>
    %cst_64 = arith.constant 1.000000e+00 : f32
    %196 = vector.broadcast %cst_64 : f32 to vector<26x56xf32>
    %197 = arith.addf %196, %195 : vector<26x56xf32>
    %198 = arith.divf %196, %197 : vector<26x56xf32>
    %199 = arith.mulf %193, %198 : vector<26x56xf32>
    %c528 = arith.constant 528 : index
    %c0_65 = arith.constant 0 : index
    %200 = vector.load %arg1[%c528, %c0_65] : memref<592x320xf32, #tpu.memory_space<vmem>>, vector<56x50xf32>
    %cst_66 = arith.constant dense<0.000000e+00> : vector<26x50xf32>
    %201 = tpu.matmul %199, %200, %cst_66 {dimension_numbers = #tpu.dot_dimension_numbers<[1], [0], [0], [1], [0, 0, 1, 1], [], []>} : vector<26x56xf32>, vector<56x50xf32>, vector<26x50xf32> -> vector<26x50xf32>
    %c584 = arith.constant 584 : index
    %c0_67 = arith.constant 0 : index
    %202 = vector.load %arg1[%c584, %c0_67] : memref<592x320xf32, #tpu.memory_space<vmem>>, vector<1x50xf32>
    %203 = vector.broadcast %202 : vector<1x50xf32> to vector<26x50xf32>
    %204 = arith.addf %201, %203 : vector<26x50xf32>
    %205 = vector.extract_strided_slice %204 {offsets = [0, 0], sizes = [10, 25], strides = [1, 1]} : vector<26x50xf32> to vector<10x25xf32>
    %cst_68 = arith.constant dense<0xFF800000> : vector<10xf32>
    %206 = vector.multi_reduction <maximumf>, %205, %cst_68 [1] : vector<10x25xf32> to vector<10xf32>
    %207 = vector.shape_cast %206 : vector<10xf32> to vector<10x1xf32>
    %208 = vector.broadcast %207 : vector<10x1xf32> to vector<10x25xf32>
    %209 = arith.subf %205, %208 : vector<10x25xf32>
    %210 = math.exp %209 : vector<10x25xf32>
    %cst_69 = arith.constant dense<0.000000e+00> : vector<10xf32>
    %211 = vector.multi_reduction <add>, %210, %cst_69 [1] : vector<10x25xf32> to vector<10xf32>
    %212 = vector.shape_cast %211 : vector<10xf32> to vector<10x1xf32>
    %213 = math.log %212 : vector<10x1xf32>
    %214 = arith.addf %207, %213 : vector<10x1xf32>
    %215 = vector.broadcast %214 : vector<10x1xf32> to vector<10x25xf32>
    %216 = arith.subf %205, %215 : vector<10x25xf32>
    %217 = vector.extract_strided_slice %204 {offsets = [10, 25], sizes = [16, 25], strides = [1, 1]} : vector<26x50xf32> to vector<16x25xf32>
    %cst_70 = arith.constant dense<0xFF800000> : vector<16xf32>
    %218 = vector.multi_reduction <maximumf>, %217, %cst_70 [1] : vector<16x25xf32> to vector<16xf32>
    %219 = vector.shape_cast %218 : vector<16xf32> to vector<16x1xf32>
    %220 = vector.broadcast %219 : vector<16x1xf32> to vector<16x25xf32>
    %221 = arith.subf %217, %220 : vector<16x25xf32>
    %222 = math.exp %221 : vector<16x25xf32>
    %cst_71 = arith.constant dense<0.000000e+00> : vector<16xf32>
    %223 = vector.multi_reduction <add>, %222, %cst_71 [1] : vector<16x25xf32> to vector<16xf32>
    %224 = vector.shape_cast %223 : vector<16xf32> to vector<16x1xf32>
    %225 = math.log %224 : vector<16x1xf32>
    %226 = arith.addf %219, %225 : vector<16x1xf32>
    %227 = vector.broadcast %226 : vector<16x1xf32> to vector<16x25xf32>
    %228 = arith.subf %217, %227 : vector<16x25xf32>
    %c96_72 = arith.constant 96 : index
    %c0_73 = arith.constant 0 : index
    %229 = vector.load %arg0[%c96_72, %c0_73] : memref<128x25xf32, #tpu.memory_space<vmem>>, vector<2x1xf32>
    %c64_74 = arith.constant 64 : index
    %c0_75 = arith.constant 0 : index
    %230 = vector.load %arg0[%c64_74, %c0_75] : memref<128x25xf32, #tpu.memory_space<vmem>>, vector<10x25xf32>
    %cst_76 = arith.constant dense<0.000000e+00> : vector<10x1xf32>
    %231 = tpu.matmul %58, %229, %cst_76 {dimension_numbers = #tpu.dot_dimension_numbers<[1], [0], [0], [1], [0, 0, 1, 1], [], []>} : vector<10x2xf32>, vector<2x1xf32>, vector<10x1xf32> -> vector<10x1xf32>
    %cst_77 = arith.constant 0.000000e+00 : f32
    %232 = vector.broadcast %cst_77 : f32 to vector<10x25xf32>
    %233 = arith.cmpf ogt, %230, %232 : vector<10x25xf32>
    %cst_78 = arith.constant 1.000000e+00 : f32
    %234 = vector.broadcast %cst_78 : f32 to vector<10x25xf32>
    %235 = arith.select %233, %230, %234 : vector<10x25xi1>, vector<10x25xf32>
    %cst_79 = arith.constant 0.000000e+00 : f32
    %236 = vector.broadcast %cst_79 : f32 to vector<10x25xf32>
    %237 = arith.cmpf ogt, %230, %236 : vector<10x25xf32>
    %238 = math.log %235 : vector<10x25xf32>
    %239 = arith.subf %238, %216 : vector<10x25xf32>
    %240 = arith.mulf %230, %239 : vector<10x25xf32>
    %cst_80 = arith.constant 0.000000e+00 : f32
    %241 = vector.broadcast %cst_80 : f32 to vector<10x25xf32>
    %242 = arith.select %237, %240, %241 : vector<10x25xi1>, vector<10x25xf32>
    %243 = vector.broadcast %231 : vector<10x1xf32> to vector<10x25xf32>
    %244 = arith.mulf %242, %243 : vector<10x25xf32>
    %cst_81 = arith.constant dense<0.000000e+00> : vector<2x25xf32>
    %245 = tpu.matmul %71, %244, %cst_81 {dimension_numbers = #tpu.dot_dimension_numbers<[1], [0], [0], [1], [0, 0, 1, 1], [], []>} : vector<2x10xf32>, vector<10x25xf32>, vector<2x25xf32> -> vector<2x25xf32>
    %cst_82 = arith.constant dense<0.000000e+00> : vector<2xf32>
    %246 = vector.multi_reduction <add>, %71, %cst_82 [1] : vector<2x10xf32> to vector<2xf32>
    %247 = vector.shape_cast %246 : vector<2xf32> to vector<2x1xf32>
    %cst_83 = arith.constant 1.000000e+00 : f32
    %248 = vector.broadcast %cst_83 : f32 to vector<2x1xf32>
    %249 = arith.maximumf %247, %248 : vector<2x1xf32>
    %250 = vector.broadcast %249 : vector<2x1xf32> to vector<2x25xf32>
    %251 = arith.divf %245, %250 : vector<2x25xf32>
    %252 = vector.shape_cast %251 : vector<2x25xf32> to vector<1x2x25xf32>
    %cst_84 = arith.constant dense<0.000000e+00> : vector<1xf32>
    %253 = vector.multi_reduction <add>, %252, %cst_84 [1, 2] : vector<1x2x25xf32> to vector<1xf32>
    %254 = vector.shape_cast %253 : vector<1xf32> to vector<1x1x1xf32>
    %255 = vector.extract %254[0, 0, 0] : f32 from vector<1x1x1xf32>
    %c80 = arith.constant 80 : index
    %c0_85 = arith.constant 0 : index
    %256 = vector.load %arg0[%c80, %c0_85] : memref<128x25xf32, #tpu.memory_space<vmem>>, vector<16x25xf32>
    %cst_86 = arith.constant dense<0.000000e+00> : vector<16x1xf32>
    %257 = tpu.matmul %64, %229, %cst_86 {dimension_numbers = #tpu.dot_dimension_numbers<[1], [0], [0], [1], [0, 0, 1, 1], [], []>} : vector<16x2xf32>, vector<2x1xf32>, vector<16x1xf32> -> vector<16x1xf32>
    %cst_87 = arith.constant 0.000000e+00 : f32
    %258 = vector.broadcast %cst_87 : f32 to vector<16x25xf32>
    %259 = arith.cmpf ogt, %256, %258 : vector<16x25xf32>
    %cst_88 = arith.constant 1.000000e+00 : f32
    %260 = vector.broadcast %cst_88 : f32 to vector<16x25xf32>
    %261 = arith.select %259, %256, %260 : vector<16x25xi1>, vector<16x25xf32>
    %cst_89 = arith.constant 0.000000e+00 : f32
    %262 = vector.broadcast %cst_89 : f32 to vector<16x25xf32>
    %263 = arith.cmpf ogt, %256, %262 : vector<16x25xf32>
    %264 = math.log %261 : vector<16x25xf32>
    %265 = arith.subf %264, %228 : vector<16x25xf32>
    %266 = arith.mulf %256, %265 : vector<16x25xf32>
    %cst_90 = arith.constant 0.000000e+00 : f32
    %267 = vector.broadcast %cst_90 : f32 to vector<16x25xf32>
    %268 = arith.select %263, %266, %267 : vector<16x25xi1>, vector<16x25xf32>
    %269 = vector.broadcast %257 : vector<16x1xf32> to vector<16x25xf32>
    %270 = arith.mulf %268, %269 : vector<16x25xf32>
    %cst_91 = arith.constant dense<0.000000e+00> : vector<2x25xf32>
    %271 = tpu.matmul %78, %270, %cst_91 {dimension_numbers = #tpu.dot_dimension_numbers<[1], [0], [0], [1], [0, 0, 1, 1], [], []>} : vector<2x16xf32>, vector<16x25xf32>, vector<2x25xf32> -> vector<2x25xf32>
    %cst_92 = arith.constant dense<0.000000e+00> : vector<2xf32>
    %272 = vector.multi_reduction <add>, %78, %cst_92 [1] : vector<2x16xf32> to vector<2xf32>
    %273 = vector.shape_cast %272 : vector<2xf32> to vector<2x1xf32>
    %cst_93 = arith.constant 1.000000e+00 : f32
    %274 = vector.broadcast %cst_93 : f32 to vector<2x1xf32>
    %275 = arith.maximumf %273, %274 : vector<2x1xf32>
    %276 = vector.broadcast %275 : vector<2x1xf32> to vector<2x25xf32>
    %277 = arith.divf %271, %276 : vector<2x25xf32>
    %278 = vector.shape_cast %277 : vector<2x25xf32> to vector<1x2x25xf32>
    %cst_94 = arith.constant dense<0.000000e+00> : vector<1xf32>
    %279 = vector.multi_reduction <add>, %278, %cst_94 [1, 2] : vector<1x2x25xf32> to vector<1xf32>
    %280 = vector.shape_cast %279 : vector<1xf32> to vector<1x1x1xf32>
    %281 = vector.extract %280[0, 0, 0] : f32 from vector<1x1x1xf32>
    %282 = arith.addf %255, %281 : f32
    %283 = vector.shape_cast %229 : vector<2x1xf32> to vector<1x2x1xf32>
    %cst_95 = arith.constant dense<0.000000e+00> : vector<1xf32>
    %284 = vector.multi_reduction <add>, %283, %cst_95 [1, 2] : vector<1x2x1xf32> to vector<1xf32>
    %285 = vector.shape_cast %284 : vector<1xf32> to vector<1x1x1xf32>
    %286 = vector.extract %285[0, 0, 0] : f32 from vector<1x1x1xf32>
    %287 = arith.divf %282, %286 : f32
    %288 = arith.addf %41, %183 : f32
    %289 = arith.addf %288, %287 : f32
    %290 = tpu.iota {dimensions = array<i32: 1>} : vector<1x128xi32>
    %c0_i32 = arith.constant 0 : i32
    %291 = vector.broadcast %c0_i32 : i32 to vector<1x128xi32>
    %292 = arith.cmpi eq, %290, %291 : vector<1x128xi32>
    %cst_96 = arith.constant 0.000000e+00 : f32
    %293 = vector.broadcast %289 : f32 to vector<1x128xf32>
    %294 = vector.broadcast %cst_96 : f32 to vector<1x128xf32>
    %295 = arith.select %292, %293, %294 : vector<1x128xi1>, vector<1x128xf32>
    %c1_i32 = arith.constant 1 : i32
    %296 = vector.broadcast %c1_i32 : i32 to vector<1x128xi32>
    %297 = arith.cmpi eq, %290, %296 : vector<1x128xi32>
    %cst_97 = arith.constant 0.000000e+00 : f32
    %298 = vector.broadcast %41 : f32 to vector<1x128xf32>
    %299 = vector.broadcast %cst_97 : f32 to vector<1x128xf32>
    %300 = arith.select %297, %298, %299 : vector<1x128xi1>, vector<1x128xf32>
    %301 = arith.addf %295, %300 : vector<1x128xf32>
    %c2_i32 = arith.constant 2 : i32
    %302 = vector.broadcast %c2_i32 : i32 to vector<1x128xi32>
    %303 = arith.cmpi eq, %290, %302 : vector<1x128xi32>
    %cst_98 = arith.constant 0.000000e+00 : f32
    %304 = vector.broadcast %183 : f32 to vector<1x128xf32>
    %305 = vector.broadcast %cst_98 : f32 to vector<1x128xf32>
    %306 = arith.select %303, %304, %305 : vector<1x128xi1>, vector<1x128xf32>
    %307 = arith.addf %301, %306 : vector<1x128xf32>
    %c3_i32 = arith.constant 3 : i32
    %308 = vector.broadcast %c3_i32 : i32 to vector<1x128xi32>
    %309 = arith.cmpi eq, %290, %308 : vector<1x128xi32>
    %cst_99 = arith.constant 0.000000e+00 : f32
    %310 = vector.broadcast %287 : f32 to vector<1x128xf32>
    %311 = vector.broadcast %cst_99 : f32 to vector<1x128xf32>
    %312 = arith.select %309, %310, %311 : vector<1x128xi1>, vector<1x128xf32>
    %313 = arith.addf %307, %312 : vector<1x128xf32>
    %c0_100 = arith.constant 0 : index
    %c0_101 = arith.constant 0 : index
    %314 = vector.load %arg2[%c0_100, %c0_101] : memref<1x128xf32, #tpu.memory_space<vmem>>, vector<1x128xf32>
    tpu.vector_store %arg2[%c0_100, %c0_101], %313 {strides = array<i32>} : memref<1x128xf32, #tpu.memory_space<vmem>>, vector<1x128xf32>,
    return
  }
}

</mosaic_0001>

<bundles_post_ra>
// kernel: deepicl_forward.1
= control target key start
LH: loop header
LB: loop body
LE: loop exit
PB: predicated region body
PF: predicated region fallthrough
CT: control target
= control target key end

     0   :  { %vm22_vm0 = vcmask 195584   ;;  %vm90_vm1 = vcmask 257024   ;;  %vm88_vm2 = vcmask 261120   ;;  %vm102_vm3 = vcmask 1043456   ;;  %s1887_s11 = smov 112   ;;  %s1889_s5 = smov 118   ;;  %s2743_s1 = inlined_call_operand.vmem [shape: f32[592,320], index: 1, kind: input, shape index: {}]   ;;  %s2744_s0 = inlined_call_operand.vmem [shape: f32[128,25], index: 0, kind: input, shape index: {}]   ;;  %s2745_s2 = inlined_call_operand.vmem [shape: f32[1,128], index: 2, kind: output, shape index: {}]  }
   0x1   :  { %v21_v0 = vld [vmem:[%s2743_s1 + $0x30] sm:$0xff]  ;;  %v20_v1 = vld [vmem:[%s2743_s1 + $0x18] sm:$0xff]  ;;  %v19_v2 = vld [vmem:[%s2743_s1] sm:$0xff]  ;;  %vm217_vm4 = vcmask 1045504   ;;  %vm307_vm5 = vcmask 1041408   ;;  %vm189_vm6 = vcmask 130048  }
   0x2   :  { %60 = vmatpush.msra.mxu0 %v21_v0  ;;  %v11_v3 = vld [vmem:[%s2744_s0] sm:$0xff]  ;;  %v12_v4 = vld [vmem:[%s2744_s0 + $0x8] sm:$0xff]  ;;  %v13_v5 = vld [vmem:[%s2744_s0 + $0x10] sm:$0xff]  ;;  %vm712_vm15 = vcmask 523264   ;;  %s1893_s24 = smov 16  }
   0x3   :  { %v14_v6 = vld [vmem:[%s2744_s0 + $0x18] sm:$0xff]  ;;  %v127_v8 = vld [vmem:[%s2743_s1 + $0x90] sm:$0xff]  ;;  %v125_v11 = vld [vmem:[%s2743_s1 + $0x60] sm:$0xff] }
   0x4   :  { %61 = vmatpush.msra.mxu0 %v20_v1  ;;  %v126_v9 = vld [vmem:[%s2743_s1 + $0x78] sm:$0xff]  ;;  %144 = vmatpush.msra.mxu1 %v127_v8  ;;  %v124_v12 = vld [vmem:[%s2743_s1 + $0x48] sm:$0xff]  ;;  %v15_v15 = vld [vmem:[%s2744_s0 + $0x20] sm:$0xff] }
   0x5   :  { %v16_v21 = vld [vmem:[%s2744_s0 + $0x28] sm:$0xff]  ;;  %v17_v33 = vld [vmem:[%s2744_s0 + $0x30] sm:$0xff]  ;;  %v18_v40 = vld [vmem:[%s2744_s0 + $0x38] sm:$0xf] }
   0x6   :  { %62 = vmatpush.msra.mxu0 %v19_v2  ;;  %145 = vmatpush.msra.mxu1 %v126_v9  ;;  %v186_v47 = vld [vmem:[%s2743_s1 + $0x108] sm:$0xff]  ;;  %v185_v48 = vld [vmem:[%s2743_s1 + $0xf0] sm:$0xff]  ;;  %v323_v49 = vld [vmem:[%s2743_s1 + $0x1b8] sm:$0xff] }
   0x7   :  { %1642 = vmatmul.msk.f32.vlgmr.msra.gmra.mxu0 %vm22_vm0, %v11_v3  ;;  %239 = vmatpush.msra.mxu3 %v186_v47  ;;  %v184_v50 = vld [vmem:[%s2743_s1 + $0xd8] sm:$0xff]  ;;  %v320_v51 = vld [vmem:[%s2743_s1 + $0x1a0] sm:$0xff]  ;;  %v317_v52 = vld [vmem:[%s2743_s1 + $0x188] sm:$0xff] }
   0x8   :  { %146 = vmatpush.msra.mxu1 %v125_v11  ;;  %v183_v53 = vld [vmem:[%s2743_s1 + $0xc0] sm:$0xff]  ;;  %v314_v55 = vld [vmem:[%s2743_s1 + $0x170] sm:$0xff]  ;;  %v321_v56 = vld [vmem:[%s2743_s1 + $0x1a8] sm:$0xff] }
   0x9   :  { %240 = vmatpush.msra.mxu3 %v185_v48  ;;  %v324_v54 = vld [vmem:[%s2743_s1 + $0x1c0] sm:$0xff]  ;;  %v702_v57 = vld [vmem:[%s2743_s1 + $0x4c8] sm:$0xff]  ;;  %v318_v59 = vld [vmem:[%s2743_s1 + $0x190] sm:$0xff] }
   0xa   :  { %147 = vmatpush.msra.mxu1 %v124_v12  ;;  %v315_v60 = vld [vmem:[%s2743_s1 + $0x178] sm:$0xff]  ;;  %v128_v62 = vld [vmem:[%s2743_s1 + $0xa8] ss:$0 sm:$0xff]  ;;  %v701_v11 = vld [vmem:[%s2743_s1 + $0x4b0] sm:$0xff] }
   0xb   :  { %241 = vmatpush.msra.mxu3 %v184_v50  ;;  %v187_v12 = vld [vmem:[%s2743_s1 + $0x120] sm:$0xff]  ;;  %v684_v47 = vld [vmem:[%s2743_s1 + $0x318] sm:$0xff] }
   0xc   :  { %385 = vmatpush.msrb.mxu1 %v323_v49  ;;  %v683_v49 = vld [vmem:[%s2743_s1 + $0x300] sm:$0xff] }
   0xd   :  { %242 = vmatpush.msra.mxu3 %v183_v53  ;;  %v681_v53 = vld [vmem:[%s2743_s1 + $0x2d0] sm:$0xff] }
   0xe   :  { %386 = vmatpush.msrb.mxu1 %v320_v51  ;;  %v682_v51 = vld [vmem:[%s2743_s1 + $0x2e8] sm:$0xff] }
   0xf   :  { %1643 = vmatmul.msk.f32.gmra.mxu0 %vm22_vm0, %v12_v4  ;;  %414 = vmatpush.msrb.mxu3 %v324_v54  ;;  %v709_v54 = vld [vmem:[%s2743_s1 + $0x570] sm:$0xff] }
  0x10   :  { %387 = vmatpush.msrb.mxu1 %v317_v52  ;;  %v710_v52 = vld [vmem:[%s2743_s1 + $0x588] sm:$0xff] }
  0x11   :  { %415 = vmatpush.msrb.mxu3 %v321_v56  ;;  %v708_v56 = vld [vmem:[%s2743_s1 + $0x558] sm:$0xff] }
  0x12   :  { %388 = vmatpush.msrb.mxu1 %v314_v55  ;;  %v680_v55 = vld [vmem:[%s2743_s1 + $0x2b8] sm:$0xff] }
  0x13   :  { %416 = vmatpush.msrb.mxu3 %v318_v59  ;;  %v707_v59 = vld [vmem:[%s2743_s1 + $0x540] sm:$0xff] }
  0x15   :  { %417 = vmatpush.msrb.mxu3 %v315_v60 }
  0x17   :  { %1644 = vmatmul.msk.f32.gmra.mxu0 %vm22_vm0, %v13_v5 }
  0x1f   :  { %1645 = vmatmul.msk.f32.gmra.mxu0 %vm22_vm0, %v14_v6 }
  0x27   :  { %1646 = vmatmul.msk.f32.gmra.mxu0 %vm22_vm0, %v15_v15  ;;  %v699_v15 = vld [vmem:[%s2743_s1 + $0x480] sm:$0xff] }
  0x2f   :  { %1647 = vmatmul.msk.f32.gmra.mxu0 %vm22_vm0, %v16_v21  ;;  %v696_v21 = vld [vmem:[%s2743_s1 + $0x438] sm:$0xff] }
  0x37   :  { %1648 = vmatmul.msk.f32.gmra.mxu0 %vm22_vm0, %v17_v33 }
  0x3f   :  { %1649 = vmatmul.msk.f32.gmra.mxu0 %vm22_vm0, %v18_v40 }
  0x84   :  { %v64_v7 = vpop.f32.mrf.mxu0 }
  0x85   :  { %v89_v16 = vsel %vm88_vm2, %v64_v7, 0.0 }
  0x8c   :  { %v67_v10 = vpop.f32.mrf.mxu0 }
  0x8d   :  { %v91_v13 = vsel %vm90_vm1, %v67_v10, 0.0  ;;  %v103_v20 = vrot.slane %v67_v10, 4  ;;  %v188_v10 = vld [vmem:[%s2743_s1 + $0x138] sm:$0xff] }
  0x8e   :  { %v92_v17 = vadd.f32 %v91_v13, %v89_v16  ;;  %207 = vmatpush.msra.mxu2 %v188_v10  ;;  %v700_v13 = vld [vmem:[%s2743_s1 + $0x498] sm:$0xff] }
  0x8f   :  { %v319_v16 = vld [vmem:[%s2743_s1 + $0x198] sm:$0xff] }
  0x90   :  { %v93_v19 = vrot.slane %v92_v17, 4  ;;  %208 = vmatpush.msra.mxu2 %v187_v12  ;;  %v250_v12 = vld [vmem:[%s2743_s1 + $0x150] ss:$0 sm:$0xff] }
  0x92   :  { %v94_v25 = vadd.f32 %v93_v19, %v92_v17  ;;  %v698_v17 = vld [vmem:[%s2743_s1 + $0x468] sm:$0xff]  ;;  %v697_v19 = vld [vmem:[%s2743_s1 + $0x450] sm:$0xff] }
  0x94   :  { %v70_v14 = vpop.f32.mrf.mxu0  ;;  %v95_v31 = vrot.slane %v94_v25, 2 }
  0x95   :  { %v104_v18 = vrot.slane %v70_v14, 4  ;;  %v322_v14 = vld [vmem:[%s2743_s1 + $0x1b0] sm:$0xff] }
  0x96   :  { %v96_v35 = vadd.f32 %v95_v31, %v94_v25  ;;  %356 = vmatpush.msrb.mxu2 %v322_v14  ;;  %v692_v25 = vld [vmem:[%s2743_s1 + $0x3d8] sm:$0xff]  ;;  %v152_v31 = vld [vmem:[%s2744_s0 + $0x68] sm:$0x1] }
  0x97   :  { %v105_v23 = vsel %vm102_vm3, %v103_v20, %v104_v18  ;;  %v313_v20 = vld [vmem:[%s2743_s1 + $0x168] sm:$0xff] }
  0x98   :  { %v111_v27 = vsel %vm88_vm2, %v105_v23, 0.0  ;;  %v97_v39 = vrot.slane %v96_v35, 1  ;;  %357 = vmatpush.msrb.mxu2 %v319_v16  ;;  %v694_v23 = vld [vmem:[%s2743_s1 + $0x408] sm:$0xff] }
  0x9a   :  { %v98_v42 = vadd.f32 %v97_v39, %v96_v35 }
  0x9c   :  { %v73_v22 = vpop.f32.mrf.mxu0 }
  0x9d   :  { %v106_v24 = vrot.slane %v73_v22, 4  ;;  %v695_v22 = vld [vmem:[%s2743_s1 + $0x420] sm:$0xff] }
  0x9f   :  { %v107_v26 = vsel %vm102_vm3, %v104_v18, %v106_v24  ;;  %v114_v30 = vsel %vm90_vm1, %v106_v24, 0.0  ;;  %v316_v18 = vld [vmem:[%s2743_s1 + $0x180] sm:$0xff]  ;;  %v693_v24 = vld [vmem:[%s2743_s1 + $0x3f0] sm:$0xff] }
  0xa0   :  { %v112_v28 = vsel %vm88_vm2, %v107_v26, 0.0  ;;  %358 = vmatpush.msrb.mxu2 %v316_v18  ;;  %v691_v26 = vld [vmem:[%s2743_s1 + $0x3c0] sm:$0xff] }
  0xa1   :  { %v113_v29 = vadd.f32 %v112_v28, %v111_v27  ;;  %v690_v27 = vld [vmem:[%s2743_s1 + $0x3a8] sm:$0xff]  ;;  %v689_v28 = vld [vmem:[%s2743_s1 + $0x390] sm:$0xff] }
  0xa2   :  { %359 = vmatpush.msrb.mxu2 %v313_v20 }
  0xa3   :  { %v115_v32 = vadd.f32 %v114_v30, %v113_v29  ;;  %v688_v29 = vld [vmem:[%s2743_s1 + $0x378] sm:$0xff]  ;;  %v687_v30 = vld [vmem:[%s2743_s1 + $0x360] sm:$0xff] }
  0xa4   :  { %v1969_v46 = vpop.f32.mrf.mxu0 }
  0xa5   :  { %v116_v34 = vrot.slane %v115_v32, 4 }
  0xa7   :  { %v117_v36 = vadd.f32 %v116_v34, %v115_v32 }
  0xa9   :  { %v118_v37 = vrot.slane %v117_v36, 2 }
  0xab   :  { %v119_v38 = vadd.f32 %v118_v37, %v117_v36  ;;  %v2110_v37 = vld [vmem:[%s2743_s1 + $0x1c8] ss:$8 sm:$0x7] }
  0xac   :  { %v2004_v58 = vpop.f32.mrf.mxu0  ;;  %v2116_v40 = vperm.slane %v2110_v37, 2  ;;  %v2206_v18 = vperm.slane %v2110_v37, 0 }
  0xad   :  { %v120_v41 = vrot.slane %v119_v38, 1  ;;  %v218_v61 = vrot.slane %v2004_v58, 2 }
  0xaf   :  { %v121_v43 = vadd.f32 %v120_v41, %v119_v38  ;;  %v2113_v38 = vperm.slane %v2110_v37, 1 }
  0xb1   :  { %v122_v44 = vadd.f32 %v121_v43, %v98_v42  ;;  %v686_v42 = vld [vmem:[%s2743_s1 + $0x348] sm:$0xff] }
  0xb3   :  { %v123_v45 = vmul.f32 0.03125, %v122_v44  ;;  %v685_v44 = vld [vmem:[%s2743_s1 + $0x330] sm:$0xff] }
  0xb4   :  { %v82_v63 = vpop.f32.mrf.mxu0 }
  0xb5   :  { %1650 = vmatmul.msk.f32.vlgmr.msra.gmra.mxu1 %vm88_vm2, %v123_v45  ;;  %v219_v0 = vrot.slane %v82_v63, 2  ;;  %v706_v63 = vld [vmem:[%s2743_s1 + $0x528] sm:$0xff] }
  0xb6   :  { %754 = vmatpush.msra.mxu1 %v702_v57  ;;  %v679_v57 = vld [vmem:[%s2743_s1 + $0x2a0] sm:$0xff] }
  0xb7   :  { %v220_v3 = vsel %vm217_vm4, %v218_v61, %v219_v0  ;;  %v678_v61 = vld [vmem:[%s2743_s1 + $0x288] sm:$0xff] }
  0xb8   :  { %1652 = vmatmul.msk.f32.vlgmr.msra.gmra.mxu3 %vm88_vm2, %v220_v3  ;;  %755 = vmatpush.msra.mxu1 %v701_v11  ;;  %v705_v3 = vld [vmem:[%s2743_s1 + $0x510] sm:$0xff]  ;;  %v703_v11 = vld [vmem:[%s2743_s1 + $0x4e0] sm:$0xff] }
  0xb9   :  { %791 = vmatpush.msra.mxu3 %v710_v52 }
  0xba   :  { %756 = vmatpush.msra.mxu1 %v700_v13  ;;  %v674_v13 = vld [vmem:[%s2743_s1 + $0x228] sm:$0xff] }
  0xbb   :  { %792 = vmatpush.msra.mxu3 %v709_v54 }
  0xbc   :  { %v85_v6 = vpop.f32.mrf.mxu0  ;;  %757 = vmatpush.msra.mxu1 %v699_v15  ;;  %v673_v15 = vld [vmem:[%s2743_s1 + $0x210] sm:$0xff] }
  0xbd   :  { %1665 = vmatmul.msk.f32.vlgmr.msrb.gmra.mxu1 %vm88_vm2, %v1969_v46  ;;  %v2023_v7 = vrot.slane %v85_v6, 2  ;;  %793 = vmatpush.msra.mxu3 %v708_v56  ;;  %v704_v6 = vld [vmem:[%s2743_s1 + $0x4f8] sm:$0xff] }
  0xbe   :  { %758 = vmatpush.msra.mxu1 %v698_v17 }
  0xbf   :  { %v222_v8 = vsel %vm217_vm4, %v219_v0, %v2023_v7  ;;  %794 = vmatpush.msra.mxu3 %v707_v59  ;;  %v677_v0 = vld [vmem:[%s2743_s1 + $0x270] sm:$0xff] }
  0xc0   :  { %1653 = vmatmul.msk.f32.gmra.mxu3 %vm88_vm2, %v222_v8  ;;  %759 = vmatpush.msra.mxu1 %v697_v19  ;;  %v672_v19 = vld [vmem:[%s2743_s1 + $0x1f8] sm:$0xff] }
  0xc1   :  { %795 = vmatpush.msra.mxu3 %v706_v63 }
  0xc2   :  { %760 = vmatpush.msra.mxu1 %v696_v21 }
  0xc3   :  { %796 = vmatpush.msra.mxu3 %v705_v3 }
  0xc4   :  { %761 = vmatpush.msra.mxu1 %v695_v22  ;;  %v671_v22 = vld [vmem:[%s2743_s1 + $0x1e0] sm:$0xff] }
  0xc5   :  { %797 = vmatpush.msra.mxu3 %v704_v6 }
  0xc6   :  { %762 = vmatpush.msra.mxu1 %v694_v23 }
  0xc7   :  { %798 = vmatpush.msra.mxu3 %v703_v11 }
  0xc8   :  { %1669 = vmatmul.msk.f32.vlgmr.msrb.gmra.mxu3 %vm88_vm2, %v1969_v46  ;;  %763 = vmatpush.msra.mxu1 %v693_v24 }
  0xca   :  { %764 = vmatpush.msra.mxu1 %v692_v25 }
  0xcc   :  { %765 = vmatpush.msra.mxu1 %v691_v26 }
  0xce   :  { %766 = vmatpush.msra.mxu1 %v690_v27 }
  0xd0   :  { %767 = vmatpush.msra.mxu1 %v689_v28 }
  0xd2   :  { %768 = vmatpush.msra.mxu1 %v688_v29 }
  0xd4   :  { %769 = vmatpush.msra.mxu1 %v687_v30 }
  0xd6   :  { %1695 = vmatpush.msk.msrb.mxu1 %vm307_vm5, %v2023_v7 }
 0x132   :  { %v149_v1 = vpop.f32.mrf.mxu1 }
 0x133   :  { %v2018_v2 = vadd.f32 %v149_v1, %v128_v62 }
 0x135   :  { %v153_v4 = vmul.f32 0.5, %v2018_v2 }
 0x137   :  { %v154_v5 = vmul.f32 1.442695, %v153_v4 }
 0x139   :  { %1753 = vpow2.f32 %v154_v5  ;;  %v676_v5 = vld [vmem:[%s2743_s1 + $0x258] sm:$0xff] }
 0x13a   :  { %v390_v39 = vpop.f32.mrf.mxu1 }
 0x13b   :  { %v2103_v35 = vpop.f32.mrf.mxu3  ;;  %v2122_v43 = vadd.f32 %v390_v39, %v2113_v38 }
 0x13d   :  { %v1674_v48 = vmul.f32 -1.442695, %v2122_v43 }
 0x13f   :  { %v1754_v9 = vpop.eup %1753  ;;  %1755 = vpow2.f32 %v1674_v48 }
 0x140   :  { %157 = vrot.lane.b32.xlu0 %v1754_v9, %s1887_s11  ;;  %v675_v9 = vld [vmem:[%s2743_s1 + $0x240] sm:$0xff] }
 0x143   :  { %v2105_v36 = vpop.f32.mrf.mxu3 }
 0x145   :  { %v1756_v60 = vpop.eup %1755 }
 0x146   :  { %v2171_v1 = vadd.f32 1.0, %v1756_v60 }
 0x148   :  { %vm499_vm7 = vweird.f32 %v2171_v1 }
 0x14b   :  { %v419_v41 = vpop.f32.mrf.mxu3 }
 0x14c   :  { %v2128_v45 = vadd.f32 %v419_v41, %v2116_v40  ;;  %v505_v41 = vand.u32 2147483648, %v2171_v1 }
 0x14e   :  { %v1675_v50 = vmul.f32 -1.442695, %v2128_v45 }
 0x150   :  { %1757 = vpow2.f32 %v1675_v50  ;;  %v506_v50 = vor.u32 1.1754944e-38, %v505_v41 }
 0x151   :  { %1759 = vrcp.f32 %v2171_v1 }
 0x156   :  { %v1758_v62 = vpop.eup %1757 }
 0x157   :  { %v2176_v4 = vadd.f32 1.0, %v1758_v62  ;;  %v1760_v20 = vpop.eup %1759 }
 0x158   :  { %v495_v28 = vmul.f32 %v1760_v20, %v2171_v1  ;;  %vm500_vm8 = vweird.f32 %v1760_v20 }
 0x159   :  { %1761 = vrcp.f32 %v2176_v4  ;;  %vm514_vm9 = vweird.f32 %v2176_v4  ;;  %vm501_vm11 = vmor %vm499_vm7, %vm500_vm8 }
 0x15f   :  { %v1762_v23 = vpop.eup %1761 }
 0x160   :  { %v510_v29 = vmul.f32 %v1762_v23, %v2176_v4  ;;  %vm515_vm10 = vweird.f32 %v1762_v23 }
 0x161   :  { %vm516_vm12 = vmor %vm514_vm9, %vm515_vm10 }
 0x1b2   :  { %v158_v32 = vpop.permute.xlu0 %157 }
 0x1b3   :  { %v160_v33 = vmul.f32 %v158_v32, %v152_v31  ;;  %v496_v32 = vsub.f32 1.0, %v495_v28 }
 0x1b5   :  { %v161_v34 = vadd.f32 %v160_v33, %v2018_v2  ;;  %v511_v33 = vsub.f32 1.0, %v510_v29 }
 0x1b7   :  { %1651 = vmatmul.msk.f32.vlgmr.msra.gmra.mxu2 %vm189_vm6, %v161_v34  ;;  %v512_v37 = vmul.f32 %v1762_v23, %v511_v33 }
 0x1b8   :  { %725 = vmatpush.msra.mxu2 %v686_v42 }
 0x1b9   :  { %v513_v48 = vadd.f32 %v1762_v23, %v512_v37 }
 0x1ba   :  { %726 = vmatpush.msra.mxu2 %v685_v44  ;;  %v503_v44 = vand.u32 2147483647, %v2171_v1 }
 0x1bc   :  { %727 = vmatpush.msra.mxu2 %v684_v47  ;;  %v520_v47 = vand.u32 2147483648, %v2176_v4  ;;  %vm504_vm13 = vcmp.eq.f32.partialorder %v503_v44, 8.507059e+37 }
 0x1be   :  { %728 = vmatpush.msra.mxu2 %v683_v49  ;;  %v518_v49 = vand.u32 2147483647, %v2176_v4  ;;  %v521_v52 = vor.u32 1.1754944e-38, %v520_v47 }
 0x1bf   :  { %1661 = vmatmul.msk.f32.vlgmr.msrb.gmra.mxu2 %vm88_vm2, %v1969_v46 }
 0x1c0   :  { %729 = vmatpush.msra.mxu2 %v682_v51  ;;  %vm519_vm14 = vcmp.eq.f32.partialorder %v518_v49, 8.507059e+37 }
 0x1c2   :  { %730 = vmatpush.msra.mxu2 %v681_v53  ;;  %v517_v53 = vsel %vm516_vm12, %v1762_v23, %v513_v48 }
 0x1c4   :  { %731 = vmatpush.msra.mxu2 %v680_v55 }
 0x1c6   :  { %732 = vmatpush.msra.mxu2 %v679_v57  ;;  %v522_v57 = vsel %vm519_vm14, %v521_v52, %v517_v53 }
 0x1c7   :  { %v661_v62 = vmul.f32 %v522_v57, %v2128_v45 }
 0x1c8   :  { %733 = vmatpush.msra.mxu2 %v678_v61 }
 0x1ca   :  { %734 = vmatpush.msra.mxu2 %v677_v0 }
 0x1cc   :  { %735 = vmatpush.msra.mxu2 %v676_v5 }
 0x1ce   :  { %736 = vmatpush.msra.mxu2 %v675_v9 }
 0x1d0   :  { %737 = vmatpush.msra.mxu2 %v674_v13 }
 0x1d2   :  { %738 = vmatpush.msra.mxu2 %v673_v15 }
 0x1d4   :  { %739 = vmatpush.msra.mxu2 %v672_v19 }
 0x1d6   :  { %740 = vmatpush.msra.mxu2 %v671_v22 }
 0x23a   :  { %v210_v8 = vpop.f32.mrf.mxu2 }
 0x23b   :  { %v213_v10 = vperm.slane %v210_v8, 0 }
 0x23d   :  { %v245_v14 = vadd.f32 %v2103_v35, %v213_v10  ;;  %v248_v16 = vadd.f32 %v2105_v36, %v213_v10  ;;  %v497_v35 = vmul.f32 %v1760_v20, %v496_v32 }
 0x23f   :  { %v2203_v17 = vadd.f32 %v250_v12, %v245_v14  ;;  %v2215_v25 = vadd.f32 %v250_v12, %v248_v16  ;;  %v498_v42 = vadd.f32 %v1760_v20, %v497_v35 }
 0x241   :  { %v308_v21 = vrot.slane %v2203_v17, 6  ;;  %v309_v31 = vrot.slane %v2215_v25, 6  ;;  %v502_v51 = vsel %vm501_vm11, %v1760_v20, %v498_v42 }
 0x242   :  { %v361_v24 = vpop.f32.mrf.mxu2  ;;  %v507_v55 = vsel %vm504_vm13, %v506_v50, %v502_v51 }
 0x243   :  { %v2218_v26 = vadd.f32 %v361_v24, %v2206_v18  ;;  %v312_v27 = vsel %vm307_vm5, %v2004_v58, %v308_v21  ;;  %v310_v34 = vsel %vm307_vm5, %v308_v21, %v309_v31  ;;  %v660_v60 = vmul.f32 %v507_v55, %v2122_v43 }
 0x244   :  { %1662 = vmatmul.msk.f32.gmra.mxu2 %vm88_vm2, %v312_v27  ;;  %1666 = vmatmul.msk.f32.gmra.mxu1 %vm88_vm2, %v312_v27 }
 0x245   :  { %v1673_v30 = vmul.f32 -1.442695, %v2218_v26  ;;  %1670 = vmatmul.msk.f32.gmra.mxu3 %vm88_vm2, %v312_v27 }
 0x247   :  { %1763 = vpow2.f32 %v1673_v30 }
 0x24c   :  { %1663 = vmatmul.msk.f32.gmra.mxu2 %vm88_vm2, %v310_v34  ;;  %1667 = vmatmul.msk.f32.gmra.mxu1 %vm88_vm2, %v310_v34 }
 0x24d   :  { %v1764_v36 = vpop.eup %1763  ;;  %1671 = vmatmul.msk.f32.gmra.mxu3 %vm88_vm2, %v310_v34 }
 0x24e   :  { %v467_v39 = vadd.f32 1.0, %v1764_v36 }
 0x250   :  { %1765 = vrcp.f32 %v467_v39  ;;  %v490_v61 = vand.u32 2147483648, %v467_v39  ;;  %v488_v0 = vand.u32 2147483647, %v467_v39  ;;  %vm484_vm1 = vweird.f32 %v467_v39 }
 0x252   :  { %v491_v3 = vor.u32 1.1754944e-38, %v490_v61  ;;  %vm489_vm7 = vcmp.eq.f32.partialorder %v488_v0, 8.507059e+37 }
 0x254   :  { %1664 = vmatmul.msk.f32.gmra.mxu2 %vm88_vm2, %v309_v31  ;;  %1668 = vmatmul.msk.f32.gmra.mxu1 %vm88_vm2, %v309_v31 }
 0x255   :  { %1672 = vmatmul.msk.f32.gmra.mxu3 %vm88_vm2, %v309_v31 }
 0x256   :  { %v1766_v54 = vpop.eup %1765 }
 0x257   :  { %v480_v56 = vmul.f32 %v1766_v54, %v467_v39  ;;  %vm485_vm0 = vweird.f32 %v1766_v54 }
 0x258   :  { %vm486_vm3 = vmor %vm484_vm1, %vm485_vm0 }
 0x259   :  { %v481_v59 = vsub.f32 1.0, %v480_v56 }
 0x25b   :  { %v482_v63 = vmul.f32 %v1766_v54, %v481_v59 }
 0x25c   :  { %770 = vmatmul.f32.vlgmr.msra.gmra.mxu1 %v660_v60 }
 0x25d   :  { %v483_v1 = vadd.f32 %v1766_v54, %v482_v63  ;;  %1685 = vmatmul.msk.f32.vlgmr.msra.gmra.mxu3 %vm712_vm15, %v661_v62 }
 0x25f   :  { %v487_v4 = vsel %vm486_vm3, %v1766_v54, %v483_v1 }
 0x260   :  { %v492_v5 = vsel %vm489_vm7, %v491_v3, %v487_v4 }
 0x261   :  { %v659_v6 = vmul.f32 %v492_v5, %v2218_v26 }
 0x263   :  { %741 = vmatmul.f32.vlgmr.msra.gmra.mxu2 %v659_v6 }
 0x2c1   :  { %v393_v43 = vpop.f32.mrf.mxu1 }
 0x2c2   :  { %v2247_v8 = vadd.f32 %v393_v43, %v2113_v38 }
 0x2c4   :  { %v1677_v45 = vmul.f32 -1.442695, %v2247_v8 }
 0x2c6   :  { %1767 = vpow2.f32 %v1677_v45 }
 0x2c7   :  { %v364_v9 = vpop.f32.mrf.mxu2 }
 0x2c8   :  { %v2251_v10 = vadd.f32 %v364_v9, %v2206_v18  ;;  %v422_v11 = vpop.f32.mrf.mxu3 }
 0x2c9   :  { %v2254_v12 = vadd.f32 %v422_v11, %v2116_v40  ;;  %v396_v13 = vpop.f32.mrf.mxu1 }
 0x2ca   :  { %v1676_v14 = vmul.f32 -1.442695, %v2251_v10  ;;  %v2258_v15 = vadd.f32 %v396_v13, %v2113_v38 }
 0x2cb   :  { %v1678_v16 = vmul.f32 -1.442695, %v2254_v12 }
 0x2cc   :  { %v1768_v19 = vpop.eup %1767  ;;  %1769 = vpow2.f32 %v1676_v14  ;;  %v1680_v20 = vmul.f32 -1.442695, %v2258_v15 }
 0x2cd   :  { %v471_v21 = vadd.f32 1.0, %v1768_v19  ;;  %1771 = vpow2.f32 %v1678_v16 }
 0x2ce   :  { %1773 = vpow2.f32 %v1680_v20 }
 0x2cf   :  { %1775 = vrcp.f32 %v471_v21  ;;  %v367_v22 = vpop.f32.mrf.mxu2  ;;  %v550_v41 = vand.u32 2147483648, %v471_v21  ;;  %vm544_vm8 = vweird.f32 %v471_v21 }
 0x2d0   :  { %v2263_v23 = vadd.f32 %v367_v22, %v2206_v18  ;;  %v425_v24 = vpop.f32.mrf.mxu3 }
 0x2d1   :  { %v2266_v26 = vadd.f32 %v425_v24, %v2116_v40  ;;  %v399_v27 = vpop.f32.mrf.mxu1  ;;  %v551_v57 = vor.u32 1.1754944e-38, %v550_v41 }
 0x2d2   :  { %v1770_v28 = vpop.eup %1769  ;;  %v1679_v29 = vmul.f32 -1.442695, %v2263_v23  ;;  %v2270_v30 = vadd.f32 %v399_v27, %v2113_v38  ;;  %v548_v38 = vand.u32 2147483647, %v471_v21 }
 0x2d3   :  { %v1772_v31 = vpop.eup %1771  ;;  %v2272_v32 = vadd.f32 1.0, %v1770_v28  ;;  %v1681_v35 = vmul.f32 -1.442695, %v2266_v26 }
 0x2d4   :  { %v1774_v33 = vpop.eup %1773  ;;  %v2274_v34 = vadd.f32 1.0, %v1772_v31  ;;  %1777 = vpow2.f32 %v1679_v29  ;;  %v1683_v39 = vmul.f32 -1.442695, %v2270_v30  ;;  %vm2293_vm9 = vcmp.eq.f32.partialorder %v548_v38, 8.507059e+37 }
 0x2d5   :  { %v1776_v36 = vpop.eup %1775  ;;  %1779 = vrcp.f32 %v2272_v32  ;;  %v2278_v37 = vadd.f32 1.0, %v1774_v33  ;;  %v533_v50 = vand.u32 2147483647, %v2272_v32  ;;  %vm529_vm10 = vweird.f32 %v2272_v32 }
 0x2d6   :  { %1781 = vrcp.f32 %v2274_v34  ;;  %v540_v44 = vmul.f32 %v1776_v36, %v471_v21  ;;  %v565_v47 = vand.u32 2147483648, %v2274_v34  ;;  %v563_v51 = vand.u32 2147483647, %v2274_v34 }
 0x2d7   :  { %1783 = vrcp.f32 %v2278_v37  ;;  %v370_v42 = vpop.f32.mrf.mxu2  ;;  %vm559_vm11 = vweird.f32 %v2274_v34  ;;  %vm545_vm12 = vweird.f32 %v1776_v36  ;;  %vm2303_vm13 = vcmp.eq.f32.partialorder %v533_v50, 8.507059e+37 }
 0x2d8   :  { %1785 = vpow2.f32 %v1681_v35  ;;  %v2285_v48 = vadd.f32 %v370_v42, %v2206_v18  ;;  %v428_v49 = vpop.f32.mrf.mxu3  ;;  %v541_v53 = vsub.f32 1.0, %v540_v44  ;;  %v566_v62 = vor.u32 1.1754944e-38, %v565_v47  ;;  %vm546_vm0 = vmor %vm544_vm8, %vm545_vm12 }
 0x2d9   :  { %1787 = vpow2.f32 %v1683_v39  ;;  %v2290_v52 = vadd.f32 %v428_v49, %v2116_v40  ;;  %vm2310_vm14 = vcmp.eq.f32.partialorder %v563_v51, 8.507059e+37  ;;  %v535_v6 = vand.u32 2147483648, %v2272_v32  ;;  %v2353_v51 = vld [vmem:[%s2743_s1 + $0x5a0] ss:$0 sm:$0xff] }
 0x2da   :  { %v1778_v54 = vpop.eup %1777  ;;  %v1682_v55 = vmul.f32 -1.442695, %v2285_v48  ;;  %v542_v40 = vmul.f32 %v1776_v36, %v541_v53  ;;  %v593_v11 = vand.u32 2147483647, %v2278_v37  ;;  %vm589_vm3 = vweird.f32 %v2278_v37 }
 0x2db   :  { %v1780_v18 = vpop.eup %1779  ;;  %v2299_v59 = vadd.f32 1.0, %v1778_v54  ;;  %v1684_v60 = vmul.f32 -1.442695, %v2290_v52  ;;  %v595_v28 = vand.u32 2147483648, %v2278_v37  ;;  %v536_v35 = vor.u32 1.1754944e-38, %v535_v6 }
 0x2dc   :  { %v1782_v61 = vpop.eup %1781  ;;  %1789 = vpow2.f32 %v1682_v55  ;;  %v525_v63 = vmul.f32 %v1780_v18, %v2272_v32  ;;  %v543_v5 = vadd.f32 %v1776_v36, %v542_v40  ;;  %vm530_vm1 = vweird.f32 %v1780_v18 }
 0x2dd   :  { %v2307_v1 = vpop.eup %1783  ;;  %v555_v3 = vmul.f32 %v1782_v61, %v2274_v34  ;;  %1791 = vrcp.f32 %v2299_v59  ;;  %vm560_vm7 = vweird.f32 %v1782_v61  ;;  %vm813_vm12 = vcmask 80896  }
 0x2de   :  { %v1786_v43 = vpop.eup %1785  ;;  %1793 = vpow2.f32 %v1684_v60  ;;  %v526_v45 = vsub.f32 1.0, %v525_v63  ;;  %v585_v9 = vmul.f32 %v2307_v1, %v2278_v37  ;;  %v547_v19 = vsel %vm546_vm0, %v1776_v36, %v543_v5  ;;  %vm561_vm0 = vmor %vm559_vm11, %vm560_vm7 }
 0x2df   :  { %v1788_v13 = vpop.eup %1787  ;;  %v556_v14 = vsub.f32 1.0, %v555_v3  ;;  %v2320_v16 = vadd.f32 1.0, %v1786_v43  ;;  %v552_v21 = vsel %vm2293_vm9, %v551_v57, %v547_v19  ;;  %vm590_vm8 = vweird.f32 %v2307_v1  ;;  %vm531_vm9 = vmor %vm529_vm10, %vm530_vm1  ;;  %v771_v3 = vpop.f32.mrf.mxu1 }
 0x2e0   :  { %v2323_v20 = vadd.f32 1.0, %v1788_v13  ;;  %v527_v22 = vmul.f32 %v1780_v18, %v526_v45  ;;  %v586_v24 = vsub.f32 1.0, %v585_v9  ;;  %v663_v31 = vmul.f32 %v552_v21, %v2247_v8  ;;  %v800_v9 = vpop.f32.mrf.mxu3 }
 0x2e1   :  { %v557_v27 = vmul.f32 %v1782_v61, %v556_v14  ;;  %1795 = vrcp.f32 %v2320_v16  ;;  %v608_v8 = vand.u32 2147483647, %v2320_v16  ;;  %v610_v44 = vand.u32 2147483648, %v2320_v16 }
 0x2e2   :  { %v1790_v29 = vpop.eup %1789  ;;  %v528_v33 = vadd.f32 %v1780_v18, %v527_v22  ;;  %1797 = vrcp.f32 %v2323_v20  ;;  %v587_v41 = vmul.f32 %v2307_v1, %v586_v24  ;;  %773 = vmatmul.f32.gmra.mxu1 %v663_v31  ;;  %vm2363_vm10 = vcmp.eq.f32.partialorder %v593_v11, 8.507059e+37 }
 0x2e3   :  { %v2331_v36 = vpop.eup %1791  ;;  %v558_v39 = vadd.f32 %v1782_v61, %v557_v27  ;;  %v2334_v38 = vadd.f32 1.0, %v1790_v29  ;;  %vm604_vm11 = vweird.f32 %v2320_v16  ;;  %v611_v0 = vor.u32 1.1754944e-38, %v610_v44 }
 0x2e4   :  { %v1794_v42 = vpop.eup %1793  ;;  %v532_v47 = vsel %vm531_vm9, %v1780_v18, %v528_v33  ;;  %v570_v49 = vmul.f32 %v2331_v36, %v2299_v59  ;;  %v588_v56 = vadd.f32 %v2307_v1, %v587_v41  ;;  %vm575_vm1 = vweird.f32 %v2331_v36 }
 0x2e5   :  { %v562_v50 = vsel %vm561_vm0, %v1782_v61, %v558_v39  ;;  %1799 = vrcp.f32 %v2334_v38  ;;  %v2348_v32 = vadd.f32 1.0, %v1794_v42  ;;  %v537_v34 = vsel %vm2303_vm13, %v536_v35, %v532_v47 }
 0x2e6   :  { %v567_v53 = vsel %vm2310_vm14, %v566_v62, %v562_v50  ;;  %v742_v54 = vpop.f32.mrf.mxu2  ;;  %v662_v55 = vmul.f32 %v537_v34, %v2251_v10  ;;  %v571_v57 = vsub.f32 1.0, %v570_v49  ;;  %v596_v61 = vor.u32 1.1754944e-38, %v595_v28  ;;  %vm591_vm14 = vmor %vm589_vm3, %vm590_vm8 }
 0x2e7   :  { %v1796_v18 = vpop.eup %1795  ;;  %v664_v60 = vmul.f32 %v567_v53, %v2254_v12  ;;  %1801 = vrcp.f32 %v2348_v32  ;;  %vm2369_vm13 = vcmp.eq.f32.partialorder %v608_v8, 8.507059e+37  ;;  %v743_v10 = vadd.f32 %v742_v54, %v2353_v51 }
 0x2e8   :  { %v600_v63 = vmul.f32 %v1796_v18, %v2320_v16  ;;  %744 = vmatmul.f32.gmra.mxu2 %v662_v55  ;;  %v2378_v12 = vpop.eup %1797  ;;  %v592_v4 = vsel %vm591_vm14, %v2307_v1, %v588_v56  ;;  %v572_v5 = vmul.f32 %v2331_v36, %v571_v57  ;;  %vm574_vm7 = vweird.f32 %v2299_v59 }
 0x2e9   :  { %1686 = vmatmul.msk.f32.gmra.mxu3 %vm712_vm15, %v664_v60  ;;  %v772_v43 = vadd.f32 %v771_v3, %v743_v10  ;;  %v597_v45 = vsel %vm2363_vm10, %v596_v61, %v592_v4  ;;  %v578_v1 = vand.u32 2147483647, %v2299_v59  ;;  %v580_v14 = vand.u32 2147483648, %v2299_v59  ;;  %vm2395_vm8 = vmor %vm574_vm7, %vm575_vm1 }
 0x2ea   :  { %v601_v6 = vsub.f32 1.0, %v600_v63  ;;  %v666_v11 = vmul.f32 %v597_v45, %v2258_v15  ;;  %v573_v13 = vadd.f32 %v2331_v36, %v572_v5  ;;  %vm605_vm3 = vweird.f32 %v1796_v18 }
 0x2eb   :  { %v2387_v37 = vpop.eup %1799  ;;  %v2393_v21 = vadd.f32 %v800_v9, %v772_v43  ;;  %v630_v24 = vmul.f32 %v2378_v12, %v2323_v20  ;;  %vm649_vm9 = vweird.f32 %v2348_v32  ;;  %v653_v15 = vand.u32 2147483647, %v2348_v32  ;;  %vm606_vm10 = vmor %vm604_vm11, %vm605_vm3 }
 0x2ec   :  { %v602_v19 = vmul.f32 %v1796_v18, %v601_v6  ;;  %776 = vmatmul.f32.gmra.mxu1 %v666_v11  ;;  %v577_v59 = vsel %vm2395_vm8, %v2331_v36, %v573_v13  ;;  %v581_v28 = vor.u32 1.1754944e-38, %v580_v14  ;;  %vm579_vm0 = vcmp.eq.f32.partialorder %v578_v1, 8.507059e+37 }
 0x2ed   :  { %v1802_v27 = vpop.eup %1801  ;;  %v814_v33 = vsel %vm813_vm12, %v2393_v21, -inf  ;;  %v655_v35 = vand.u32 2147483648, %v2348_v32  ;;  %v631_v41 = vsub.f32 1.0, %v630_v24  ;;  %v640_v42 = vand.u32 2147483648, %v2323_v20 }
 0x2ee   :  { %v603_v29 = vadd.f32 %v1796_v18, %v602_v19  ;;  %v645_v31 = vmul.f32 %v1802_v27, %v2348_v32  ;;  %815 = vmax.xlane.f32.xlu1 %v814_v33  ;;  %v582_v39 = vsel %vm579_vm0, %v581_v28, %v577_v59  ;;  %v615_v47 = vmul.f32 %v2387_v37, %v2334_v38 }
 0x2ef   :  { %v665_v44 = vmul.f32 %v582_v39, %v2263_v23  ;;  %v632_v16 = vmul.f32 %v2378_v12, %v631_v41  ;;  %vm635_vm11 = vweird.f32 %v2378_v12  ;;  %v638_v50 = vand.u32 2147483647, %v2323_v20 }
 0x2f0   :  { %v607_v8 = vsel %vm606_vm10, %v1796_v18, %v603_v29  ;;  %v646_v36 = vsub.f32 1.0, %v645_v31  ;;  %vm650_vm14 = vweird.f32 %v1802_v27  ;;  %v616_v54 = vsub.f32 1.0, %v615_v47 }
 0x2f1   :  { %v612_v49 = vsel %vm2369_vm13, %v611_v0, %v607_v8  ;;  %747 = vmatmul.f32.gmra.mxu2 %v665_v44  ;;  %v633_v23 = vadd.f32 %v2378_v12, %v632_v16  ;;  %vm634_vm1 = vweird.f32 %v2323_v20  ;;  %v641_v55 = vor.u32 1.1754944e-38, %v640_v42  ;;  %vm651_vm3 = vmor %vm649_vm9, %vm650_vm14  ;;  %v255_v8 = vld [vmem:[%s2744_s0 + $0x2a] sm:$0xff] }
 0x2f2   :  { %v667_v34 = vmul.f32 %v612_v49, %v2266_v26  ;;  %v647_v53 = vmul.f32 %v1802_v27, %v646_v36  ;;  %v625_v56 = vand.u32 2147483648, %v2334_v38  ;;  %vm636_vm13 = vmor %vm634_vm1, %vm635_vm11  ;;  %v617_v18 = vmul.f32 %v2387_v37, %v616_v54  ;;  %v254_v36 = vld [vmem:[%s2744_s0 + $0x28] sm:$0x3] }
 0x2f3   :  { %vm620_vm7 = vweird.f32 %v2387_v37  ;;  %v623_v26 = vand.u32 2147483647, %v2334_v38  ;;  %vm654_vm8 = vcmp.eq.f32.partialorder %v653_v15, 8.507059e+37  ;;  %v656_v60 = vor.u32 1.1754944e-38, %v655_v35 }
 0x2f4   :  { %v648_v57 = vadd.f32 %v1802_v27, %v647_v53  ;;  %1687 = vmatmul.msk.f32.gmra.mxu3 %vm712_vm15, %v667_v34  ;;  %v637_v20 = vsel %vm636_vm13, %v2378_v12, %v633_v23  ;;  %vm639_vm0 = vcmp.eq.f32.partialorder %v638_v50, 8.507059e+37  ;;  %v618_v63 = vadd.f32 %v2387_v37, %v617_v18 }
 0x2f5   :  { %v642_v61 = vsel %vm639_vm0, %v641_v55, %v637_v20  ;;  %vm619_vm10 = vweird.f32 %v2334_v38  ;;  %v626_v0 = vor.u32 1.1754944e-38, %v625_v56  ;;  %vm624_vm9 = vcmp.eq.f32.partialorder %v623_v26, 8.507059e+37 }
 0x2f6   :  { %v652_v40 = vsel %vm651_vm3, %v1802_v27, %v648_v57  ;;  %v669_v10 = vmul.f32 %v642_v61, %v2270_v30  ;;  %vm621_vm11 = vmor %vm619_vm10, %vm620_vm7  ;;  %v1888_v6 = vmov 24   ;;  %vm887_vm14 = vcmask 162898  }
 0x2f7   :  { %v657_v62 = vsel %vm654_vm8, %v656_v60, %v652_v40  ;;  %v622_v32 = vsel %vm621_vm11, %v2387_v37, %v618_v63  ;;  %1742 = vset.pattern.permute.xlu2 %v1888_v6  ;;  %1741 = vset.pattern.permute.xlu1 %v1888_v6  ;;  %vm891_vm1 = vcmask 162896   ;;  %vm895_vm13 = vcmask 156752  }
 0x2f8   :  { %v670_v3 = vmul.f32 %v657_v62, %v2290_v52  ;;  %779 = vmatmul.f32.gmra.mxu1 %v669_v10  ;;  %v627_v4 = vsel %vm624_vm9, %v626_v0, %v622_v32  ;;  %v257_v55 = vlaneseq  ;;  %vm1040_vm7 = vcmask 15360  }
 0x2f9   :  { %v668_v12 = vmul.f32 %v627_v4, %v2285_v48  ;;  %v1890_v61 = vmov 0.0   ;;  %vm920_vm8 = vcmask 80898  }
 0x2fa   :  { %v2475_v18 = vand.u32 127, %v257_v55 }
 0x2fb   :  { %750 = vmatmul.f32.gmra.mxu2 %v668_v12 }
 0x2fc   :  { %1688 = vmatmul.msk.f32.gmra.mxu3 %vm712_vm15, %v670_v3  ;;  %vm817_vm15 = vcmask 74752   ;;  %v2478_v60 = vcvt.s32.f32 %v2475_v18  ;;  %v253_v3 = vld [vmem:[%s2744_s0 + $0x20] sm:$0xff] }
 0x35f   :  { %v774_v37 = vpop.f32.mrf.mxu1 }
 0x361   :  { %v2439_v5 = vpop.xlane.xlu1 %815 }
 0x362   :  { %v821_v38 = vsub.f32 %v2393_v21, %v2439_v5 }
 0x364   :  { %v823_v30 = vmul.f32 1.442695, %v821_v38 }
 0x366   :  { %1803 = vpow2.f32 %v823_v30 }
 0x369   :  { %v777_v24 = vpop.f32.mrf.mxu1 }
 0x36b   :  { %v745_v52 = vpop.f32.mrf.mxu2 }
 0x36c   :  { %v746_v43 = vadd.f32 %v745_v52, %v2353_v51  ;;  %v1804_v45 = vpop.eup %1803  ;;  %v803_v11 = vpop.f32.mrf.mxu3  ;;  %v2495_v52 = vshrl.u32 %v257_v55, 7 }
 0x36d   :  { %v827_v48 = vsel %vm813_vm12, %v1804_v45, 0.0 }
 0x36e   :  { %v775_v9 = vadd.f32 %v774_v37, %v746_v43  ;;  %828 = vadd.xlane.f32.xlu2 %v827_v48  ;;  %v1751_v48 = vld [vmem:[%s2744_s0 + $0x70] ss:$0 sm:$0xff] }
 0x370   :  { %v2445_v13 = vadd.f32 %v803_v11, %v775_v9  ;;  %v295_v9 = vcvt.s32.f32 %v2495_v52  ;;  %v1113_v52 = vld [vmem:[%s2743_s1 + $0x5d0] sm:$0xff] }
 0x372   :  { %v818_v1 = vsel %vm817_vm15, %v2445_v13, -inf  ;;  %v888_v22 = vsel %vm887_vm14, %v2445_v13, -inf  ;;  %vm297_vm0 = vcmp.eq.f32.partialorder %v1751_v48, %v295_v9 }
 0x373   :  { %819 = vmax.xlane.f32.xlu0 %v818_v1 }
 0x374   :  { %v748_v14 = vpop.f32.mrf.mxu2 }
 0x375   :  { %v749_v19 = vadd.f32 %v748_v14, %v2353_v51  ;;  %v780_v33 = vpop.f32.mrf.mxu1 }
 0x376   :  { %889 = vmax.xlane.f32.xlu2 %v888_v22  ;;  %v2508_v22 = vsel %vm297_vm0, 1.0, %v1890_v61 }
 0x377   :  { %v778_v27 = vadd.f32 %v777_v24, %v749_v19  ;;  %v806_v15 = vpop.f32.mrf.mxu3  ;;  %v2513_v24 = vld [vmem:[%s2744_s0 + $0x60] sm:$0x3] }
 0x379   :  { %v2451_v59 = vadd.f32 %v806_v15, %v778_v27 }
 0x37b   :  { %v892_v28 = vsel %vm891_vm1, %v2451_v59, -inf }
 0x37c   :  { %893 = vmax.xlane.f32.xlu1 %v892_v28 }
 0x37e   :  { %v751_v29 = vpop.f32.mrf.mxu2 }
 0x37f   :  { %v752_v31 = vadd.f32 %v751_v29, %v2353_v51  ;;  %v809_v39 = vpop.f32.mrf.mxu3 }
 0x381   :  { %v781_v35 = vadd.f32 %v780_v33, %v752_v31  ;;  %v256_v31 = vld [vmem:[%s2744_s0 + $0x32] sm:$0xff] }
 0x383   :  { %v2455_v41 = vadd.f32 %v809_v39, %v781_v35 }
 0x385   :  { %v896_v42 = vsel %vm895_vm13, %v2455_v41, -inf }
 0x386   :  { %897 = vmax.xlane.f32.xlu2 %v896_v42  ;;  %v1891_v42 = vmov 0  }
 0x387   :  { %1749 = vset.pattern.permute.xlu0 %v1891_v42 }
 0x39e   :  { %278 = vperm.xlu2 %1742, %v255_v8  }
 0x3a6   :  { %267 = vperm.xlu2 %1742, %v254_v36  }
 0x3ae   :  { %1748 = vset.pattern.permute.xlu2 %v1891_v42 }
 0x3e1   :  { %v829_v51 = vpop.xlane.xlu2 %828 }
 0x3e6   :  { %v820_v44 = vpop.xlane.xlu0 %819 }
 0x3e7   :  { %v822_v47 = vsub.f32 %v2445_v13, %v820_v44 }
 0x3e9   :  { %v825_v49 = vmul.f32 1.442695, %v822_v47  ;;  %v2465_v16 = vpop.xlane.xlu2 %889 }
 0x3ea   :  { %v899_v50 = vsub.f32 %v2445_v13, %v2465_v16 }
 0x3eb   :  { %1805 = vpow2.f32 %v825_v49 }
 0x3ec   :  { %v902_v34 = vmul.f32 1.442695, %v899_v50 }
 0x3ee   :  { %1807 = vpow2.f32 %v902_v34 }
 0x3ef   :  { %v2480_v20 = vpop.xlane.xlu1 %893 }
 0x3f0   :  { %v900_v10 = vsub.f32 %v2451_v59, %v2480_v20 }
 0x3f1   :  { %v1806_v53 = vpop.eup %1805 }
 0x3f2   :  { %v830_v54 = vsel %vm817_vm15, %v1806_v53, 0.0  ;;  %v904_v0 = vmul.f32 1.442695, %v900_v10 }
 0x3f3   :  { %831 = vadd.xlane.f32.xlu1 %v830_v54 }
 0x3f4   :  { %v1808_v23 = vpop.eup %1807 }
 0x3f5   :  { %911 = vrot.lane.b32.xlu2 %v1808_v23, %s1889_s5 }
 0x3f9   :  { %v2471_v56 = vpop.xlane.xlu2 %897 }
 0x3fa   :  { %v901_v57 = vsub.f32 %v2455_v41, %v2471_v56 }
 0x3fc   :  { %v906_v26 = vmul.f32 1.442695, %v901_v57 }
 0x3fe   :  { %1809 = vpow2.f32 %v906_v26 }
 0x3ff   :  { %1811 = vpow2.f32 %v904_v0 }
 0x400   :  { %1813 = vlog2.f32 %v829_v51 }
 0x401   :  { %v279_v40 = vpop.permute.xlu2 %278 }
 0x402   :  { %vm286_vm3 = vcmp.eq.f32.partialorder %v279_v40, %v2478_v60 }
 0x403   :  { %v2484_v63 = vsel %vm286_vm3, 1.0, %v1890_v61 }
 0x404   :  { %v1810_v62 = vpop.eup %1809  ;;  %1696 = vmatmul.msk.f32.vlgmr.msrb.gmra.mxu1 %vm1040_vm7, %v2484_v63 }
 0x405   :  { %915 = vrot.lane.b32.xlu0 %v1810_v62, %s1889_s5  ;;  %v1812_v32 = vpop.eup %1811 }
 0x406   :  { %v1814_v6 = vpop.eup %1813 }
 0x407   :  { %v834_v43 = vmul.f32 0.6931472, %v1814_v6  ;;  %v1114_v6 = vld [vmem:[%s2743_s1 + $0x5e8] sm:$0xff] }
 0x409   :  { %v268_v4 = vpop.permute.xlu2 %267  ;;  %v837_v1 = vadd.f32 %v834_v43, %v2439_v5 }
 0x40a   :  { %vm271_vm11 = vcmp.eq.f32.partialorder %v268_v4, %v2478_v60 }
 0x40b   :  { %v839_v19 = vsub.f32 %v2393_v21, %v837_v1  ;;  %v1655_v29 = vsel %vm271_vm11, 1.0, %v1890_v61 }
 0x40c   :  { %262 = vperm.xlu1 %1741, %v253_v3  }
 0x414   :  { %913 = vrot.lane.b32.xlu1 %v1812_v32, %s1889_s5 }
 0x44f   :  { %v912_v12 = vpop.permute.xlu2 %911 }
 0x450   :  { %v921_v38 = vsel %vm920_vm8, %v912_v12, 0.0  ;;  %vm1244_vm8 = vcmask 457728  }
 0x451   :  { %922 = vadd.xlane.f32.xlu0 %v921_v38 }
 0x466   :  { %v832_v30 = vpop.xlane.xlu1 %831 }
 0x467   :  { %1815 = vlog2.f32 %v832_v30  ;;  %v1115_v30 = vld [vmem:[%s2743_s1 + $0x600] sm:$0xff] }
 0x46d   :  { %v1816_v45 = vpop.eup %1815 }
 0x46e   :  { %v836_v37 = vmul.f32 0.6931472, %v1816_v45 }
 0x470   :  { %v838_v11 = vadd.f32 %v836_v37, %v820_v44 }
 0x472   :  { %v840_v14 = vsub.f32 %v2445_v13, %v838_v11 }
 0x474   :  { %1689 = vmatpush.msk.msrb.mxu0 %vm307_vm5, %v840_v14 }
 0x476   :  { %862 = vmatpush.msrb.mxu0 %v839_v19 }
 0x477   :  { %v916_v5 = vpop.permute.xlu0 %915  ;;  %1690 = vmatmul.msk.f32.vlgmr.msrb.gmra.mxu0 %vm813_vm12, %v2508_v22 }
 0x478   :  { %1692 = vmatpush.msk.msra.mxu0 %vm307_vm5, %v2023_v7  ;;  %v927_v27 = vsel %vm817_vm15, %v916_v5, 0.0 }
 0x479   :  { %928 = vadd.xlane.f32.xlu2 %v927_v27 }
 0x47a   :  { %1710 = vmatpush.msk.msrb.mxu0 %vm307_vm5, %v2513_v24 }
 0x47e   :  { %v263_v21 = vpop.permute.xlu1 %262 }
 0x47f   :  { %vm270_vm10 = vcmp.eq.f32.partialorder %v263_v21, %v2478_v60 }
 0x480   :  { %v1654_v15 = vsel %vm270_vm10, 1.0, %v1890_v61 }
 0x481   :  { %1693 = vmatmul.msk.f32.vlgmr.msra.gmra.mxu0 %vm1040_vm7, %v1654_v15  ;;  %v1095_v43 = vpop.f32.mrf.mxu1 }
 0x482   :  { %v1103_v37 = vmul.f32 %v1095_v43, %v2203_v17 }
 0x484   :  { %v1107_v48 = vrot.slane %v1103_v37, 6 }
 0x486   :  { %v914_v7 = vpop.permute.xlu1 %913 }
 0x487   :  { %v924_v28 = vsel %vm813_vm12, %v914_v7, 0.0  ;;  %v1240_v7 = vld [vmem:[%s2743_s1 + $0x690] sm:$0xff] }
 0x488   :  { %925 = vadd.xlane.f32.xlu1 %v924_v28  ;;  %v1239_v28 = vld [vmem:[%s2743_s1 + $0x678] sm:$0xff] }
 0x489   :  { %1694 = vmatmul.msk.f32.gmra.mxu0 %vm1040_vm7, %v1655_v29 }
 0x491   :  { %1711 = vmatmul.msk.f32.vlgmr.msrb.gmra.mxu0 %vm1040_vm7, %v1654_v15  ;;  %v1241_v15 = vld [vmem:[%s2743_s1 + $0x6a8] sm:$0xff] }
 0x499   :  { %1712 = vmatmul.msk.f32.gmra.mxu0 %vm1040_vm7, %v1655_v29 }
 0x4a1   :  { %283 = vperm.xlu1 %1741, %v256_v31  }
 0x4a9   :  { %1750 = vset.pattern.permute.xlu1 %v1891_v42 }
 0x4c4   :  { %v923_v33 = vpop.xlane.xlu0 %922 }
 0x4c5   :  { %1817 = vlog2.f32 %v923_v33  ;;  %v1238_v33 = vld [vmem:[%s2743_s1 + $0x660] sm:$0xff] }
 0x4cb   :  { %v1818_v8 = vpop.eup %1817 }
 0x4cc   :  { %v931_v44 = vmul.f32 0.6931472, %v1818_v8  ;;  %v1237_v8 = vld [vmem:[%s2743_s1 + $0x648] sm:$0xff] }
 0x4ce   :  { %v936_v50 = vadd.f32 %v931_v44, %v2465_v16 }
 0x4d0   :  { %v939_v23 = vsub.f32 %v2445_v13, %v936_v50 }
 0x4d2   :  { %v945_v62 = vrot.slane %v939_v23, 2 }
 0x4ec   :  { %v929_v35 = vpop.xlane.xlu2 %928 }
 0x4ed   :  { %1819 = vlog2.f32 %v929_v35 }
 0x4f3   :  { %v1820_v36 = vpop.eup %1819 }
 0x4f4   :  { %v2534_v39 = vpop.f32.mrf.mxu0  ;;  %v935_v47 = vmul.f32 0.6931472, %v1820_v36 }
 0x4f6   :  { %v938_v34 = vadd.f32 %v935_v47, %v2471_v56 }
 0x4f8   :  { %v941_v55 = vsub.f32 %v2455_v41, %v938_v34 }
 0x4fa   :  { %v948_v10 = vrot.slane %v941_v55, 2 }
 0x4fb   :  { %v926_v51 = vpop.xlane.xlu1 %925 }
 0x4fc   :  { %1821 = vlog2.f32 %v926_v51  ;;  %v1236_v51 = vld [vmem:[%s2743_s1 + $0x630] sm:$0xff] }
 0x4fe   :  { %v1066_v49 = vpop.f32.mrf.mxu0 }
 0x4ff   :  { %v1101_v45 = vmul.f32 %v1066_v49, %v1969_v46 }
 0x502   :  { %v1822_v53 = vpop.eup %1821 }
 0x503   :  { %v933_v54 = vmul.f32 0.6931472, %v1822_v53 }
 0x505   :  { %v937_v57 = vadd.f32 %v933_v54, %v2480_v20  ;;  %v1752_v20 = vld [vmem:[%s2744_s0 + $0x78] ss:$0 sm:$0xff] }
 0x506   :  { %v1069_v26 = vpop.f32.mrf.mxu0  ;;  %vm302_vm14 = vcmp.eq.f32.partialorder %v1752_v20, %v295_v9 }
 0x507   :  { %v940_v40 = vsub.f32 %v2451_v59, %v937_v57  ;;  %v1102_v9 = vmul.f32 %v1069_v26, %v2004_v58  ;;  %v2590_v58 = vld [vmem:[%s2743_s1 + $0x618] ss:$0 sm:$0xff] }
 0x509   :  { %v946_v0 = vrot.slane %v940_v40, 2  ;;  %v1111_v11 = vsel %vm307_vm5, %v1102_v9, %v1107_v48 }
 0x50b   :  { %v947_v3 = vsel %vm217_vm4, %v945_v62, %v946_v0  ;;  %v949_v16 = vsel %vm217_vm4, %v946_v0, %v948_v10 }
 0x50c   :  { %v1743_v32 = vpack.i.bf16 %v947_v3, %v949_v16 }
 0x50e   :  { %v2544_v56 = vpop.f32.mrf.mxu0  ;;  %1744 = vrot.lane.b32.xlu2 %v1743_v32, %s1889_s5 }
 0x513   :  { %v284_v13 = vpop.permute.xlu1 %283 }
 0x514   :  { %vm287_vm9 = vcmp.eq.f32.partialorder %v284_v13, %v2478_v60  ;;  %v2559_v60 = vsel %vm302_vm14, 1.0, %v1890_v61 }
 0x515   :  { %v2549_v41 = vsel %vm287_vm9, 1.0, %v1890_v61  ;;  %v1112_v61 = vld [vmem:[%s2743_s1 + $0x5b8] sm:$0xff] }
 0x516   :  { %1697 = vmatmul.msk.f32.gmra.mxu1 %vm1040_vm7, %v2549_v41  ;;  %v1395_v59 = vpop.f32.mrf.mxu0 }
 0x517   :  { %1419 = vperm.xlu2 %1748, %v1395_v59  }
 0x568   :  { %v1745_v4 = vpop.permute.xlu2 %1744 }
 0x569   :  { %v1746_v12 = vunpack.i.l.bf16 %v1745_v4  ;;  %v1747_v38 = vunpack.i.h.bf16 %v1745_v4 }
 0x56b   :  { %973 = vmatpush.msrb.mxu2 %v1746_v12 }
 0x56d   :  { %974 = vmatpush.msrb.mxu2 %v1747_v38 }
 0x56e   :  { %1691 = vmatmul.msk.f32.vlgmr.msrb.gmra.mxu2 %vm189_vm6, %v2559_v60 }
 0x56f   :  { %1139 = vmatpush.msra.mxu2 %v1115_v30 }
 0x571   :  { %1140 = vmatpush.msra.mxu2 %v1114_v6 }
 0x573   :  { %1141 = vmatpush.msra.mxu2 %v1113_v52 }
 0x575   :  { %1142 = vmatpush.msra.mxu2 %v1112_v61 }
 0x576   :  { %1698 = vmatmul.msk.f32.vlgmr.msra.gmra.mxu2 %vm88_vm2, %v1101_v45 }
 0x57e   :  { %1699 = vmatmul.msk.f32.gmra.mxu2 %vm88_vm2, %v1111_v11 }
 0x593   :  { %v1098_v1 = vpop.f32.mrf.mxu1 }
 0x594   :  { %v1104_v14 = vmul.f32 %v1098_v1, %v2215_v25  ;;  %v1242_v25 = vld [vmem:[%s2743_s1 + $0x6c0] sm:$0xff] }
 0x595   :  { %1266 = vmatpush.msrb.mxu3 %v1242_v25 }
 0x596   :  { %v1108_v19 = vrot.slane %v1104_v14, 6 }
 0x597   :  { %1267 = vmatpush.msrb.mxu3 %v1241_v15 }
 0x598   :  { %v1109_v5 = vsel %vm307_vm5, %v1107_v48, %v1108_v19 }
 0x599   :  { %1700 = vmatmul.msk.f32.gmra.mxu2 %vm88_vm2, %v1109_v5  ;;  %1268 = vmatpush.msrb.mxu3 %v1240_v7 }
 0x59b   :  { %1269 = vmatpush.msrb.mxu3 %v1239_v28 }
 0x59d   :  { %1270 = vmatpush.msrb.mxu3 %v1238_v33 }
 0x59f   :  { %1271 = vmatpush.msrb.mxu3 %v1237_v8 }
 0x5a1   :  { %1701 = vmatmul.msk.f32.gmra.mxu2 %vm88_vm2, %v1108_v19  ;;  %1272 = vmatpush.msrb.mxu3 %v1236_v51 }
 0x5f1   :  { %v2585_v46 = vpop.f32.mrf.mxu2 }
 0x5f9   :  { %v1144_v17 = vpop.f32.mrf.mxu2 }
 0x5fa   :  { %v1145_v27 = vadd.f32 %v1144_v17, %v2590_v58 }
 0x5fc   :  { %v1702_v21 = vmul.f32 -1.442695, %v1145_v27 }
 0x5fe   :  { %1823 = vpow2.f32 %v1702_v21 }
 0x601   :  { %v1147_v29 = vpop.f32.mrf.mxu2 }
 0x602   :  { %v1148_v31 = vadd.f32 %v1147_v29, %v2590_v58 }
 0x604   :  { %v1824_v35 = vpop.eup %1823  ;;  %v1703_v42 = vmul.f32 -1.442695, %v1148_v31 }
 0x605   :  { %v1168_v36 = vadd.f32 1.0, %v1824_v35 }
 0x606   :  { %1825 = vpow2.f32 %v1703_v42 }
 0x607   :  { %1827 = vrcp.f32 %v1168_v36  ;;  %v1183_v53 = vand.u32 2147483648, %v1168_v36  ;;  %v1181_v23 = vand.u32 2147483647, %v1168_v36  ;;  %vm1177_vm1 = vweird.f32 %v1168_v36 }
 0x609   :  { %v1184_v26 = vor.u32 1.1754944e-38, %v1183_v53  ;;  %vm1182_vm3 = vcmp.eq.f32.partialorder %v1181_v23, 8.507059e+37 }
 0x60c   :  { %v1826_v44 = vpop.eup %1825 }
 0x60d   :  { %v1828_v47 = vpop.eup %1827  ;;  %v1169_v49 = vadd.f32 1.0, %v1826_v44 }
 0x60e   :  { %v1173_v50 = vmul.f32 %v1828_v47, %v1168_v36  ;;  %vm1178_vm2 = vweird.f32 %v1828_v47 }
 0x60f   :  { %1829 = vrcp.f32 %v1169_v49  ;;  %vm1179_vm13 = vmor %vm1177_vm1, %vm1178_vm2  ;;  %v1198_v16 = vand.u32 2147483648, %v1169_v49  ;;  %v1196_v13 = vand.u32 2147483647, %v1169_v49  ;;  %vm1192_vm10 = vweird.f32 %v1169_v49 }
 0x610   :  { %v1174_v34 = vsub.f32 1.0, %v1173_v50  ;;  %v1243_v50 = vld [vmem:[%s2743_s1 + $0x6d8] ss:$0 sm:$0xff]  ;;  %s1892_s1 = smov 103  }
 0x611   :  { %v1199_v4 = vor.u32 1.1754944e-38, %v1198_v16  ;;  %vm1197_vm9 = vcmp.eq.f32.partialorder %v1196_v13, 8.507059e+37 }
 0x612   :  { %v1175_v54 = vmul.f32 %v1828_v47, %v1174_v34 }
 0x614   :  { %v1176_v55 = vadd.f32 %v1828_v47, %v1175_v54 }
 0x615   :  { %v1830_v57 = vpop.eup %1829 }
 0x616   :  { %v1180_v40 = vsel %vm1179_vm13, %v1828_v47, %v1176_v55  ;;  %v1188_v62 = vmul.f32 %v1830_v57, %v1169_v49  ;;  %vm1193_vm0 = vweird.f32 %v1830_v57 }
 0x617   :  { %v1185_v10 = vsel %vm1182_vm3, %v1184_v26, %v1180_v40  ;;  %vm1194_vm11 = vmor %vm1192_vm10, %vm1193_vm0 }
 0x618   :  { %v1232_v0 = vmul.f32 %v1185_v10, %v1145_v27  ;;  %v1189_v3 = vsub.f32 1.0, %v1188_v62 }
 0x61a   :  { %v1190_v32 = vmul.f32 %v1830_v57, %v1189_v3  ;;  %1706 = vmatmul.msk.f32.vlgmr.msrb.gmra.mxu3 %vm1244_vm8, %v1232_v0 }
 0x61c   :  { %v1191_v59 = vadd.f32 %v1830_v57, %v1190_v32  ;;  %v1150_v20 = vpop.f32.mrf.mxu2 }
 0x61d   :  { %v1151_v12 = vadd.f32 %v1150_v20, %v2590_v58 }
 0x61e   :  { %v1195_v38 = vsel %vm1194_vm11, %v1830_v57, %v1191_v59 }
 0x61f   :  { %v1200_v30 = vsel %vm1197_vm9, %v1199_v4, %v1195_v38  ;;  %v1704_v6 = vmul.f32 -1.442695, %v1151_v12  ;;  %vm1290_vm9 = vcmask 197632  }
 0x620   :  { %v1233_v52 = vmul.f32 %v1200_v30, %v1148_v31 }
 0x621   :  { %1831 = vpow2.f32 %v1704_v6  ;;  %v1420_v6 = vpop.permute.xlu2 %1419 }
 0x622   :  { %1707 = vmatmul.msk.f32.gmra.mxu3 %vm1244_vm8, %v1233_v52 }
 0x624   :  { %v1153_v61 = vpop.f32.mrf.mxu2 }
 0x625   :  { %v1154_v43 = vadd.f32 %v1153_v61, %v2590_v58 }
 0x627   :  { %v1832_v45 = vpop.eup %1831  ;;  %v1705_v37 = vmul.f32 -1.442695, %v1154_v43 }
 0x628   :  { %v1170_v9 = vadd.f32 1.0, %v1832_v45 }
 0x629   :  { %1833 = vpow2.f32 %v1705_v37 }
 0x62a   :  { %1835 = vrcp.f32 %v1170_v9  ;;  %v1213_v5 = vand.u32 2147483648, %v1170_v9  ;;  %v1211_v27 = vand.u32 2147483647, %v1170_v9  ;;  %vm1207_vm2 = vweird.f32 %v1170_v9 }
 0x62c   :  { %v1214_v58 = vor.u32 1.1754944e-38, %v1213_v5  ;;  %vm1212_vm13 = vcmp.eq.f32.partialorder %v1211_v27, 8.507059e+37 }
 0x62f   :  { %v1834_v48 = vpop.eup %1833 }
 0x630   :  { %v1836_v11 = vpop.eup %1835  ;;  %v1171_v1 = vadd.f32 1.0, %v1834_v48 }
 0x631   :  { %v1203_v14 = vmul.f32 %v1836_v11, %v1170_v9  ;;  %vm1208_vm14 = vweird.f32 %v1836_v11  ;;  %v1371_v9 = vld [vmem:[%s2744_s0 + $0x48] sm:$0x3] }
 0x632   :  { %1837 = vrcp.f32 %v1171_v1  ;;  %vm1209_vm1 = vmor %vm1207_vm2, %vm1208_vm14  ;;  %v1228_v33 = vand.u32 2147483648, %v1171_v1  ;;  %v1226_v42 = vand.u32 2147483647, %v1171_v1  ;;  %vm1222_vm0 = vweird.f32 %v1171_v1 }
 0x633   :  { %v1204_v19 = vsub.f32 1.0, %v1203_v14  ;;  %vm1286_vm14 = vcmask 203776   ;;  %vm1322_vm2 = vcmask 402632  }
 0x634   :  { %v1229_v36 = vor.u32 1.1754944e-38, %v1228_v33  ;;  %vm1227_vm11 = vcmp.eq.f32.partialorder %v1226_v42, 8.507059e+37 }
 0x635   :  { %v1205_v17 = vmul.f32 %v1836_v11, %v1204_v19 }
 0x637   :  { %v1206_v21 = vadd.f32 %v1836_v11, %v1205_v17 }
 0x638   :  { %v1838_v25 = vpop.eup %1837 }
 0x639   :  { %v1210_v15 = vsel %vm1209_vm1, %v1836_v11, %v1206_v21  ;;  %v1218_v7 = vmul.f32 %v1838_v25, %v1171_v1  ;;  %vm1223_vm3 = vweird.f32 %v1838_v25  ;;  %vm1314_vm1 = vcmask 408778   ;;  %v1370_v11 = vld [vmem:[%s2744_s0 + $0x40] sm:$0xff] }
 0x63a   :  { %v1215_v28 = vsel %vm1212_vm13, %v1214_v58, %v1210_v15  ;;  %vm1224_vm10 = vmor %vm1222_vm0, %vm1223_vm3  ;;  %vm1399_vm13 = vcmp.gt.f32.partialorder %v1371_v9, 0.0  ;;  %vm1398_vm3 = vcmp.gt.f32.partialorder %v1370_v11, 0.0  ;;  %vm1347_vm0 = vcmask 203778  }
 0x63b   :  { %v1234_v29 = vmul.f32 %v1215_v28, %v1151_v12  ;;  %v1219_v31 = vsub.f32 1.0, %v1218_v7  ;;  %v1401_v48 = vsel %vm1399_vm13, %v1371_v9, 1.0 }
 0x63d   :  { %v1220_v35 = vmul.f32 %v1838_v25, %v1219_v31  ;;  %1708 = vmatmul.msk.f32.gmra.mxu3 %vm1244_vm8, %v1234_v29 }
 0x63f   :  { %v1221_v8 = vadd.f32 %v1838_v25, %v1220_v35 }
 0x641   :  { %v1225_v51 = vsel %vm1224_vm10, %v1838_v25, %v1221_v8  ;;  %vm1010_vm10 = vcmask 73728  }
 0x642   :  { %v1230_v44 = vsel %vm1227_vm11, %v1229_v36, %v1225_v51 }
 0x643   :  { %v1235_v47 = vmul.f32 %v1230_v44, %v1154_v43 }
 0x645   :  { %1709 = vmatmul.msk.f32.gmra.mxu3 %vm1244_vm8, %v1235_v47  ;;  %vm1318_vm8 = vcmask 408776  }
 0x69d   :  { %v1274_v49 = vpop.f32.mrf.mxu3 }
 0x69e   :  { %v2628_v23 = vadd.f32 %v1274_v49, %v1243_v50 }
 0x6a0   :  { %v1287_v55 = vsel %vm1286_vm14, %v2628_v23, -inf }
 0x6a5   :  { %v1277_v34 = vpop.f32.mrf.mxu3 }
 0x6a6   :  { %v2624_v53 = vadd.f32 %v1277_v34, %v1243_v50 }
 0x6a8   :  { %v1291_v54 = vsel %vm1290_vm9, %v2624_v53, -inf  ;;  %v1315_v52 = vsel %vm1314_vm1, %v2624_v53, -inf }
 0x6a9   :  { %1292 = vmax.xlane.f32.xlu0 %v1291_v54 }
 0x6b1   :  { %1288 = vmax.xlane.f32.xlu0 %v1287_v55 }
 0x6c0   :  { %v1280_v57 = vpop.f32.mrf.mxu3 }
 0x6c1   :  { %v2632_v26 = vadd.f32 %v1280_v57, %v1243_v50 }
 0x6c3   :  { %v1319_v40 = vsel %vm1318_vm8, %v2632_v26, -inf }
 0x6c4   :  { %1320 = vmax.xlane.f32.xlu2 %v1319_v40 }
 0x6c8   :  { %v1283_v20 = vpop.f32.mrf.mxu3 }
 0x6c9   :  { %v2638_v4 = vadd.f32 %v1283_v20, %v1243_v50 }
 0x6cb   :  { %v1323_v30 = vsel %vm1322_vm2, %v2638_v4, -inf }
 0x71c   :  { %v1293_v62 = vpop.xlane.xlu0 %1292 }
 0x71d   :  { %v1295_v10 = vsub.f32 %v2624_v53, %v1293_v62 }
 0x71f   :  { %v1298_v0 = vmul.f32 1.442695, %v1295_v10 }
 0x721   :  { %1839 = vpow2.f32 %v1298_v0 }
 0x724   :  { %v1289_v3 = vpop.xlane.xlu0 %1288 }
 0x725   :  { %v1294_v16 = vsub.f32 %v2628_v23, %v1289_v3 }
 0x727   :  { %v1840_v32 = vpop.eup %1839  ;;  %v1296_v13 = vmul.f32 1.442695, %v1294_v16 }
 0x728   :  { %v1303_v59 = vsel %vm1290_vm9, %v1840_v32, 0.0 }
 0x729   :  { %1841 = vpow2.f32 %v1296_v13  ;;  %1304 = vadd.xlane.f32.xlu1 %v1303_v59 }
 0x72f   :  { %v1842_v12 = vpop.eup %1841 }
 0x730   :  { %v1300_v38 = vsel %vm1286_vm14, %v1842_v12, 0.0 }
 0x731   :  { %1301 = vadd.xlane.f32.xlu0 %v1300_v38  ;;  %1324 = vmax.xlane.f32.xlu1 %v1323_v30 }
 0x737   :  { %v2643_v61 = vpop.xlane.xlu2 %1320 }
 0x738   :  { %v1327_v43 = vsub.f32 %v2632_v26, %v2643_v61 }
 0x739   :  { %1316 = vmax.xlane.f32.xlu1 %v1315_v52 }
 0x73a   :  { %v1331_v45 = vmul.f32 1.442695, %v1327_v43 }
 0x73c   :  { %1843 = vpow2.f32 %v1331_v45 }
 0x73d   :  { %1845 = vlog2.f32 %v1401_v48 }
 0x742   :  { %v1844_v37 = vpop.eup %1843 }
 0x743   :  { %v1846_v14 = vpop.eup %1845 }
 0x744   :  { %v1405_v25 = vmul.f32 0.6931472, %v1846_v14 }
 0x745   :  { %1414 = vperm.xlu0 %1749, %v2544_v56   ;;  %v1400_v56 = vsel %vm1398_vm3, %v1370_v11, 1.0 }
 0x74d   :  { %1340 = vrot.lane.b32.xlu0 %v1844_v37, %s1892_s1 }
 0x79c   :  { %v1305_v1 = vpop.xlane.xlu1 %1304 }
 0x79d   :  { %1847 = vlog2.f32 %v1305_v1 }
 0x79e   :  { %1849 = vlog2.f32 %v1400_v56 }
 0x7a3   :  { %v1848_v19 = vpop.eup %1847 }
 0x7a4   :  { %v1309_v5 = vmul.f32 0.6931472, %v1848_v19  ;;  %v1302_v17 = vpop.xlane.xlu0 %1301  ;;  %v1325_v27 = vpop.xlane.xlu1 %1324 }
 0x7a5   :  { %1851 = vlog2.f32 %v1302_v17  ;;  %v1328_v21 = vsub.f32 %v2638_v4, %v1325_v27  ;;  %v1850_v28 = vpop.eup %1849 }
 0x7a6   :  { %v1311_v58 = vadd.f32 %v1309_v5, %v1293_v62  ;;  %v1403_v44 = vmul.f32 0.6931472, %v1850_v28 }
 0x7a7   :  { %v1333_v15 = vmul.f32 1.442695, %v1328_v21  ;;  %v1447_v21 = vsel %vm817_vm15, %v2508_v22, 0.0 }
 0x7a8   :  { %v1313_v7 = vsub.f32 %v2624_v53, %v1311_v58  ;;  %v1476_v58 = vld [vmem:[%s2744_s0 + $0x50] sm:$0xff] }
 0x7a9   :  { %1853 = vpow2.f32 %v1333_v15 }
 0x7aa   :  { %v1407_v29 = vsub.f32 %v1405_v25, %v1313_v7 }
 0x7ab   :  { %v1852_v31 = vpop.eup %1851 }
 0x7ac   :  { %v1409_v33 = vmul.f32 %v1407_v29, %v1371_v9  ;;  %v1307_v35 = vmul.f32 0.6931472, %v1852_v31  ;;  %v1317_v42 = vpop.xlane.xlu1 %1316 }
 0x7ad   :  { %v1326_v8 = vsub.f32 %v2624_v53, %v1317_v42 }
 0x7ae   :  { %v1411_v36 = vsel %vm1399_vm13, %v1409_v33, 0.0  ;;  %v1310_v51 = vadd.f32 %v1307_v35, %v1289_v3 }
 0x7af   :  { %v1854_v47 = vpop.eup %1853  ;;  %v1329_v49 = vmul.f32 1.442695, %v1326_v8  ;;  %v1423_v50 = vmul.f32 %v1420_v6, %v1411_v36 }
 0x7b0   :  { %v1312_v34 = vsub.f32 %v2628_v23, %v1310_v51  ;;  %1342 = vrot.lane.b32.xlu2 %v1854_v47, %s1892_s1 }
 0x7b1   :  { %1855 = vpow2.f32 %v1329_v49  ;;  %1713 = vmatpush.msk.msra.mxu1 %vm307_vm5, %v1423_v50 }
 0x7b2   :  { %v1406_v54 = vsub.f32 %v1403_v44, %v1312_v34 }
 0x7b4   :  { %v1408_v55 = vmul.f32 %v1406_v54, %v1370_v11 }
 0x7b6   :  { %v1410_v57 = vsel %vm1398_vm3, %v1408_v55, 0.0 }
 0x7b7   :  { %v1856_v40 = vpop.eup %1855  ;;  %v1415_v62 = vpop.permute.xlu0 %1414 }
 0x7b8   :  { %v1422_v10 = vmul.f32 %v1415_v62, %v1410_v57  ;;  %1338 = vrot.lane.b32.xlu1 %v1856_v40, %s1892_s1 }
 0x7ba   :  { %1442 = vmatpush.msra.mxu1 %v1422_v10 }
 0x7bb   :  { %1714 = vmatmul.msk.f32.vlgmr.msra.gmra.mxu1 %vm813_vm12, %v2508_v22  ;;  %vm1561_vm12 = vcmask 123904  }
 0x7bc   :  { %1715 = vmatpush.msk.msrb.mxu1 %vm307_vm5, %v2513_v24 }
 0x7bf   :  { %v1341_v23 = vpop.permute.xlu0 %1340 }
 0x7c0   :  { %v1351_v0 = vsel %vm1286_vm14, %v1341_v23, 0.0 }
 0x7c1   :  { %1352 = vadd.xlane.f32.xlu0 %v1351_v0  ;;  %v1562_v0 = vsel %vm1561_vm12, %v2559_v60, 0.0 }
 0x7c3   :  { %1716 = vmatmul.msk.f32.vlgmr.msrb.gmra.mxu1 %vm1040_vm7, %v2484_v63 }
 0x7cb   :  { %1717 = vmatmul.msk.f32.gmra.mxu1 %vm1040_vm7, %v2549_v41 }
 0x80a   :  { %v1343_v3 = vpop.permute.xlu2 %1342 }
 0x80b   :  { %v1354_v16 = vsel %vm1290_vm9, %v1343_v3, 0.0 }
 0x80c   :  { %1355 = vadd.xlane.f32.xlu2 %v1354_v16 }
 0x82a   :  { %v1339_v32 = vpop.permute.xlu1 %1338 }
 0x82b   :  { %v1348_v13 = vsel %vm1347_vm0, %v1339_v32, 0.0  ;;  %vm1592_vm0 = vcmask 1024  }
 0x82c   :  { %1349 = vadd.xlane.f32.xlu1 %v1348_v13  ;;  %v163_v13 = vmul.f32 %v2018_v2, %v2018_v2 }
 0x834   :  { %v1353_v12 = vpop.xlane.xlu0 %1352 }
 0x835   :  { %1857 = vlog2.f32 %v1353_v12 }
 0x838   :  { %v2676_v59 = vpop.f32.mrf.mxu1 }
 0x83b   :  { %v1858_v38 = vpop.eup %1857 }
 0x83c   :  { %v1360_v63 = vmul.f32 0.6931472, %v1858_v38  ;;  %v1894_v38 = vmov 2.0  }
 0x83e   :  { %v1364_v41 = vadd.f32 %v1360_v63, %v2643_v61 }
 0x840   :  { %v1495_v20 = vpop.f32.mrf.mxu1  ;;  %v1367_v43 = vsub.f32 %v2632_v26, %v1364_v41 }
 0x842   :  { %v1513_v9 = vrot.slane %v1367_v43, 2 }
 0x845   :  { %1531 = vperm.xlu1 %1750, %v1495_v20   ;;  %v812_v20 = vld [vmem:[%s2744_s0 + $0x3a] sm:$0x3] }
 0x848   :  { %v1498_v1 = vpop.f32.mrf.mxu1 }
 0x87f   :  { %v1356_v30 = vpop.xlane.xlu2 %1355 }
 0x880   :  { %1859 = vlog2.f32 %v1356_v30 }
 0x886   :  { %v1860_v6 = vpop.eup %1859 }
 0x887   :  { %v1362_v52 = vmul.f32 0.6931472, %v1860_v6 }
 0x889   :  { %v1365_v45 = vadd.f32 %v1362_v52, %v1325_v27  ;;  %v979_v27 = vsel %vm817_vm15, %v2585_v46, -inf }
 0x88b   :  { %v1368_v37 = vsub.f32 %v2638_v4, %v1365_v45  ;;  %v867_v4 = vsel %vm817_vm15, %v2534_v39, -inf }
 0x88d   :  { %v1515_v48 = vrot.slane %v1368_v37, 2 }
 0x88f   :  { %v1516_v11 = vsel %vm217_vm4, %v1513_v9, %v1515_v48 }
 0x890   :  { %1519 = vrot.lane.b32.xlu0 %v1516_v11, %s1892_s1 }
 0x898   :  { %1536 = vperm.xlu0 %1749, %v1498_v1  }
 0x89f   :  { %v1350_v56 = vpop.xlane.xlu1 %1349 }
 0x8a0   :  { %1861 = vlog2.f32 %v1350_v56 }
 0x8a6   :  { %v1862_v14 = vpop.eup %1861 }
 0x8a7   :  { %v1358_v19 = vmul.f32 0.6931472, %v1862_v14 }
 0x8a9   :  { %v1363_v61 = vadd.f32 %v1358_v19, %v1317_v42 }
 0x8ab   :  { %v1366_v5 = vsub.f32 %v2624_v53, %v1363_v61  ;;  %v1477_v53 = vld [vmem:[%s2744_s0 + $0x58] sm:$0xff] }
 0x8ac   :  { %vm1502_vm5 = vcmp.gt.f32.partialorder %v1477_v53, 0.0 }
 0x8ad   :  { %v1512_v17 = vrot.slane %v1366_v5, 2  ;;  %v1504_v25 = vsel %vm1502_vm5, %v1477_v53, 1.0 }
 0x8ae   :  { %1863 = vlog2.f32 %v1504_v25 }
 0x8af   :  { %v1514_v26 = vsel %vm217_vm4, %v1512_v17, %v1513_v9  ;;  %vm1501_vm4 = vcmp.gt.f32.partialorder %v1476_v58, 0.0 }
 0x8b0   :  { %1517 = vrot.lane.b32.xlu2 %v1514_v26, %s1892_s1  ;;  %v1503_v15 = vsel %vm1501_vm4, %v1476_v58, 1.0 }
 0x8b1   :  { %1865 = vlog2.f32 %v1503_v15 }
 0x8b4   :  { %v1864_v7 = vpop.eup %1863 }
 0x8b5   :  { %v1508_v28 = vmul.f32 0.6931472, %v1864_v7 }
 0x8b7   :  { %v1866_v31 = vpop.eup %1865  ;;  %v1532_v49 = vpop.permute.xlu1 %1531 }
 0x8b8   :  { %v1506_v35 = vmul.f32 0.6931472, %v1866_v31 }
 0x8c2   :  { %868 = vmax.xlane.f32.xlu0 %v867_v4 }
 0x8d9   :  { %980 = vmax.xlane.f32.xlu2 %v979_v27 }
 0x8e1   :  { %1448 = vadd.xlane.f32.xlu2 %v1447_v21 }
 0x902   :  { %v1520_v29 = vpop.permute.xlu0 %1519 }
 0x903   :  { %v1524_v22 = vsub.f32 %v1508_v28, %v1520_v29 }
 0x905   :  { %v1526_v33 = vmul.f32 %v1524_v22, %v1477_v53  ;;  %v169_v22 = vmul.f32 1.442695, %v2018_v2 }
 0x907   :  { %v1528_v42 = vsel %vm1502_vm5, %v1526_v33, 0.0  ;;  %vm176_vm5 = vcmask 122880  }
 0x90a   :  { %v1537_v8 = vpop.permute.xlu0 %1536  ;;  %v1518_v36 = vpop.permute.xlu2 %1517 }
 0x90b   :  { %v1540_v51 = vmul.f32 %v1537_v8, %v1528_v42  ;;  %v1523_v44 = vsub.f32 %v1506_v35, %v1518_v36 }
 0x90d   :  { %v1525_v47 = vmul.f32 %v1523_v44, %v1476_v58  ;;  %1555 = vmatpush.msra.mxu0 %v1540_v51  ;;  %v162_v44 = vadd.f32 1.0, %v2018_v2 }
 0x90f   :  { %v1527_v50 = vsel %vm1501_vm4, %v1525_v47, 0.0 }
 0x910   :  { %v1539_v34 = vmul.f32 %v1532_v49, %v1527_v50 }
 0x912   :  { %1556 = vmatpush.msra.mxu0 %v1539_v34 }
 0x913   :  { %1718 = vmatmul.msk.f32.vlgmr.msra.gmra.mxu0 %vm189_vm6, %v2559_v60  ;;  %vm880_vm6 = vcmp.gt.f32.partialorder %v812_v20, 0.0 }
 0x914   :  { %v881_v12 = vsel %vm880_vm6, %v812_v20, 1.0 }
 0x935   :  { %v869_v54 = vpop.xlane.xlu0 %868 }
 0x936   :  { %v870_v55 = vsub.f32 %v2534_v39, %v869_v54 }
 0x938   :  { %v871_v57 = vmul.f32 1.442695, %v870_v55 }
 0x93a   :  { %1867 = vpow2.f32 %v871_v57 }
 0x940   :  { %v1868_v40 = vpop.eup %1867 }
 0x941   :  { %v873_v62 = vsel %vm817_vm15, %v1868_v40, 0.0 }
 0x942   :  { %874 = vadd.xlane.f32.xlu1 %v873_v62 }
 0x94a   :  { %1563 = vadd.xlane.f32.xlu1 %v1562_v0 }
 0x94c   :  { %v981_v10 = vpop.xlane.xlu2 %980 }
 0x94d   :  { %v982_v23 = vsub.f32 %v2585_v46, %v981_v10 }
 0x94f   :  { %v983_v3 = vmul.f32 1.442695, %v982_v23 }
 0x951   :  { %1869 = vpow2.f32 %v983_v3 }
 0x952   :  { %1871 = vlog2.f32 %v881_v12 }
 0x954   :  { %v1449_v5 = vpop.xlane.xlu2 %1448 }
 0x955   :  { %v1450_v27 = vmax.f32 %v1449_v5, 1.0 }
 0x957   :  { %v1870_v16 = vpop.eup %1869  ;;  %vm1456_vm11 = vweird.f32 %v1450_v27 }
 0x958   :  { %v985_v32 = vsel %vm817_vm15, %v1870_v16, 0.0  ;;  %v1872_v30 = vpop.eup %1871  ;;  %v1460_v16 = vand.u32 2147483647, %v1450_v27 }
 0x959   :  { %986 = vadd.xlane.f32.xlu0 %v985_v32  ;;  %v883_v52 = vmul.f32 0.6931472, %v1872_v30  ;;  %v1462_v32 = vand.u32 2147483648, %v1450_v27 }
 0x95a   :  { %vm1461_vm8 = vcmp.eq.f32.partialorder %v1460_v16, 8.507059e+37 }
 0x96d   :  { %165 = vrot.lane.b32.xlu0 %v163_v13, %s1893_s24 }
 0x9b5   :  { %v875_v60 = vpop.xlane.xlu1 %874 }
 0x9b6   :  { %1873 = vlog2.f32 %v875_v60 }
 0x9b7   :  { %1875 = vrcp.f32 %v1894_v38  ;;  %v1463_v38 = vor.u32 1.1754944e-38, %v1462_v32 }
 0x9bc   :  { %v1874_v63 = vpop.eup %1873 }
 0x9bd   :  { %v877_v41 = vmul.f32 0.6931472, %v1874_v63  ;;  %v1876_v6 = vpop.eup %1875  ;;  %v1564_v31 = vpop.xlane.xlu1 %1563 }
 0x9be   :  { %v1003_v37 = vmul.f32 2.0, %v1876_v6  ;;  %vm1007_vm7 = vweird.f32 %v1876_v6  ;;  %v1565_v35 = vmax.f32 %v1564_v31, 1.0 }
 0x9bf   :  { %v878_v43 = vadd.f32 %v877_v41, %v869_v54 }
 0x9c0   :  { %v1004_v11 = vsub.f32 1.0, %v1003_v37  ;;  %vm1571_vm2 = vweird.f32 %v1565_v35  ;;  %v1577_v41 = vand.u32 2147483648, %v1565_v35 }
 0x9c1   :  { %v879_v45 = vsub.f32 %v2534_v39, %v878_v43  ;;  %v1575_v43 = vand.u32 2147483647, %v1565_v35 }
 0x9c2   :  { %v1005_v19 = vmul.f32 %v1876_v6, %v1004_v11  ;;  %v1578_v37 = vor.u32 1.1754944e-38, %v1577_v41  ;;  %v1558_v11 = vpop.f32.mrf.mxu0 }
 0x9c3   :  { %v884_v9 = vsub.f32 %v883_v52, %v879_v45  ;;  %vm1576_vm3 = vcmp.eq.f32.partialorder %v1575_v43, 8.507059e+37 }
 0x9c4   :  { %v1006_v4 = vadd.f32 %v1876_v6, %v1005_v19 }
 0x9c5   :  { %v885_v48 = vmul.f32 %v884_v9, %v812_v20 }
 0x9c6   :  { %v1008_v53 = vsel %vm1007_vm7, %v1876_v6, %v1006_v4  ;;  %vm1625_vm7 = vcmp.eq.s32.totalorder %v2475_v18, 1 }
 0x9c7   :  { %v886_v1 = vsel %vm880_vm6, %v885_v48, 0.0 }
 0x9c8   :  { %v995_v56 = vsel %vm817_vm15, %v886_v1, 0.0 }
 0x9c9   :  { %v996_v14 = vrot.slane %v995_v56, 4 }
 0x9cb   :  { %v997_v61 = vadd.f32 %v996_v14, %v995_v56 }
 0x9cc   :  { %v987_v17 = vpop.xlane.xlu0 %986 }
 0x9cd   :  { %1877 = vlog2.f32 %v987_v17  ;;  %v998_v26 = vrot.slane %v997_v61, 2 }
 0x9ce   :  { %1879 = vrcp.f32 %v1450_v27 }
 0x9cf   :  { %v999_v21 = vadd.f32 %v998_v26, %v997_v61  ;;  %1881 = vrcp.f32 %v1565_v35  ;;  %v1593_v61 = vsel %vm1592_vm0, %v2513_v24, 0.0 }
 0x9d0   :  { %1883 = vpow2.f32 %v169_v22 }
 0x9d1   :  { %v1000_v39 = vrot.slane %v999_v21, 1 }
 0x9d3   :  { %v1878_v25 = vpop.eup %1877  ;;  %v1001_v58 = vadd.f32 %v1000_v39, %v999_v21 }
 0x9d4   :  { %v989_v15 = vmul.f32 0.6931472, %v1878_v25  ;;  %v1880_v42 = vpop.eup %1879 }
 0x9d5   :  { %v1009_v7 = vmul.f32 %v1008_v53, %v1001_v58  ;;  %v1452_v36 = vmul.f32 %v1880_v42, %v1450_v27  ;;  %v1882_v34 = vpop.eup %1881  ;;  %vm1457_vm14 = vweird.f32 %v1880_v42 }
 0x9d6   :  { %v990_v28 = vadd.f32 %v989_v15, %v981_v10  ;;  %v1567_v10 = vmul.f32 %v1882_v34, %v1565_v35  ;;  %vm1572_vm1 = vweird.f32 %v1882_v34 }
 0x9d7   :  { %v1011_v29 = vsel %vm1010_vm10, %v1009_v7, 0.0  ;;  %v1453_v54 = vsub.f32 1.0, %v1452_v36  ;;  %vm1573_vm13 = vmor %vm1571_vm2, %vm1572_vm1 }
 0x9d8   :  { %v991_v33 = vsub.f32 %v2585_v46, %v990_v28  ;;  %1012 = vadd.xlane.f32.xlu0 %v1011_v29  ;;  %v1884_v46 = vpop.eup %1883  ;;  %v1568_v2 = vsub.f32 1.0, %v1567_v10 }
 0x9d9   :  { %v1454_v0 = vmul.f32 %v1880_v42, %v1453_v54 }
 0x9da   :  { %v992_v8 = vsub.f32 %v883_v52, %v991_v33  ;;  %v1569_v60 = vmul.f32 %v1882_v34, %v1568_v2 }
 0x9dc   :  { %v993_v51 = vmul.f32 %v992_v8, %v812_v20  ;;  %v1455_v20 = vadd.f32 %v1880_v42, %v1454_v0  ;;  %v1570_v52 = vadd.f32 %v1882_v34, %v1569_v60 }
 0x9de   :  { %v994_v47 = vsel %vm880_vm6, %v993_v51, 0.0  ;;  %v1574_v48 = vsel %vm1573_vm13, %v1882_v34, %v1570_v52 }
 0x9df   :  { %v166_v49 = vpop.permute.xlu0 %165  ;;  %v1021_v50 = vsel %vm817_vm15, %v994_v47, 0.0  ;;  %vm1458_vm15 = vmor %vm1456_vm11, %vm1457_vm14  ;;  %v1579_v1 = vsel %vm1576_vm3, %v1578_v37, %v1574_v48  ;;  %vm1629_vm11 = vcmp.eq.s32.totalorder %v2475_v18, 2  ;;  %vm1633_vm14 = vcmp.eq.s32.totalorder %v2475_v18, 3 }
 0x9e0   :  { %v168_v55 = vsub.f32 %v162_v44, %v166_v49  ;;  %v1022_v57 = vrot.slane %v1021_v50, 4  ;;  %v1459_v63 = vsel %vm1458_vm15, %v1880_v42, %v1455_v20  ;;  %v1580_v14 = vmul.f32 %v1579_v1, %v1558_v11 }
 0x9e1   :  { %v1464_v45 = vsel %vm1461_vm8, %v1463_v38, %v1459_v63 }
 0x9e2   :  { %v171_v40 = vsub.f32 %v168_v55, %v1884_v46  ;;  %v1023_v62 = vadd.f32 %v1022_v57, %v1021_v50  ;;  %v1465_v9 = vmul.f32 %v1464_v45, %v2676_v59  ;;  %v1581_v19 = vsel %vm1290_vm9, %v1580_v14, 0.0 }
 0x9e4   :  { %173 = vrot.lane.b32.xlu2 %v171_v40, %s1887_s11  ;;  %v1024_v23 = vrot.slane %v1023_v62, 2  ;;  %v1466_v56 = vsel %vm1290_vm9, %v1465_v9, 0.0 }
 0x9e6   :  { %v1025_v3 = vadd.f32 %v1024_v23, %v1023_v62 }
 0x9e8   :  { %v1026_v13 = vrot.slane %v1025_v3, 1 }
 0x9ea   :  { %v1027_v12 = vadd.f32 %v1026_v13, %v1025_v3 }
 0x9ec   :  { %v1028_v30 = vmul.f32 %v1027_v12, %v1008_v53 }
 0x9ee   :  { %v1029_v6 = vsel %vm1010_vm10, %v1028_v30, 0.0  ;;  %vm1622_vm10 = vcmp.eq.s32.totalorder %v2475_v18, 0 }
 0x9ef   :  { %1030 = vadd.xlane.f32.xlu1 %v1029_v6 }
 0x9f7   :  { %1467 = vadd.xlane.f32.xlu1 %v1466_v56 }
 0x9ff   :  { %1582 = vadd.xlane.f32.xlu1 %v1581_v19 }
 0xa0d   :  { %1594 = vadd.xlane.f32.xlu2 %v1593_v61 }
 0xa3e   :  { %v174_v5 = vpop.permute.xlu2 %173 }
 0xa3f   :  { %v177_v17 = vsel %vm176_vm5, %v174_v5, 0.0 }
 0xa40   :  { %178 = vadd.xlane.f32.xlu1 %v177_v17 }
 0xa4b   :  { %v1013_v4 = vpop.xlane.xlu0 %1012 }
 0xa4c   :  { %v1014_v27 = vrot.slane %v1013_v4, 4 }
 0xa4e   :  { %v1015_v15 = vadd.f32 %v1014_v27, %v1013_v4 }
 0xa50   :  { %v1016_v24 = vrot.slane %v1015_v15, 2 }
 0xa52   :  { %v1017_v8 = vadd.f32 %v1016_v24, %v1015_v15 }
 0xa54   :  { %v1018_v50 = vrot.slane %v1017_v8, 1 }
 0xa56   :  { %v1019_v40 = vadd.f32 %v1018_v50, %v1017_v8 }
 0xa62   :  { %v1031_v59 = vpop.xlane.xlu1 %1030 }
 0xa63   :  { %v1032_v39 = vrot.slane %v1031_v59, 4 }
 0xa65   :  { %v1033_v28 = vadd.f32 %v1032_v39, %v1031_v59 }
 0xa67   :  { %v1034_v33 = vrot.slane %v1033_v28, 2 }
 0xa69   :  { %v1035_v51 = vadd.f32 %v1034_v33, %v1033_v28 }
 0xa6a   :  { %v1468_v26 = vpop.xlane.xlu1 %1467 }
 0xa6b   :  { %v1469_v25 = vrot.slane %v1468_v26, 4  ;;  %v1036_v34 = vrot.slane %v1035_v51, 1 }
 0xa6d   :  { %v1470_v29 = vadd.f32 %v1469_v25, %v1468_v26  ;;  %v1037_v10 = vadd.f32 %v1036_v34, %v1035_v51 }
 0xa6f   :  { %v1471_v35 = vrot.slane %v1470_v29, 2 }
 0xa71   :  { %v1472_v44 = vadd.f32 %v1471_v35, %v1470_v29 }
 0xa72   :  { %v1583_v21 = vpop.xlane.xlu1 %1582 }
 0xa73   :  { %v1584_v58 = vrot.slane %v1583_v21, 4  ;;  %v1473_v55 = vrot.slane %v1472_v44, 1 }
 0xa75   :  { %v1585_v22 = vadd.f32 %v1584_v58, %v1583_v21  ;;  %v1474_v23 = vadd.f32 %v1473_v55, %v1472_v44 }
 0xa77   :  { %v1586_v42 = vrot.slane %v1585_v22, 2 }
 0xa79   :  { %v1587_v47 = vadd.f32 %v1586_v42, %v1585_v22 }
 0xa7b   :  { %v1588_v46 = vrot.slane %v1587_v47, 1 }
 0xa7d   :  { %v1589_v0 = vadd.f32 %v1588_v46, %v1587_v47 }
 0xa80   :  { %v1595_v53 = vpop.xlane.xlu2 %1594 }
 0xa81   :  { %v1596_v7 = vrot.slane %v1595_v53, 4 }
 0xa83   :  { %v1597_v31 = vadd.f32 %v1596_v7, %v1595_v53 }
 0xa85   :  { %v1598_v36 = vrot.slane %v1597_v31, 2 }
 0xa87   :  { %v1599_v49 = vadd.f32 %v1598_v36, %v1597_v31 }
 0xa89   :  { %v1600_v62 = vrot.slane %v1599_v49, 1 }
 0xa8b   :  { %v1601_v3 = vadd.f32 %v1600_v62, %v1599_v49 }
 0xab3   :  { %v179_v54 = vpop.xlane.xlu1 %178 }
 0xab4   :  { %v180_v57 = vmul.f32 -0.5, %v179_v54 }
 0xab6   :  { %1719 = vpush %v180_v57 }
 0xab7   :  { %1721 = vpush %v1019_v40 }
 0xab8   :  { %1723 = vpush %v1037_v10 }
 0xab9   :  { %1725 = vpush %v1474_v23 }
 0xaba   :  { %1727 = vpush %v1589_v0 }
 0xabb   :  { %1729 = vpush %v1601_v3 }
 0xae7   :  { %s2728_s0 = spop %1719 }
 0xae8   :  { %s1722_s11 = spop %1721  ;;  %v1626_v6 = vstv %s2728_s0 }
 0xae9   :  { %s1724_s27 = spop %1723  ;;  %v1627_v45 = vsel %vm1625_vm7, %v1626_v6, 0.0 }
 0xaea   :  { %s2730_s28 = sadd.f32 %s1724_s27, %s1722_s11  ;;  %s1726_s29 = spop %1725 }
 0xaeb   :  { %s1728_s30 = spop %1727 }
 0xaec   :  { %s1620_s3 = sadd.f32 %s2728_s0, %s2730_s28  ;;  %s1730_s4 = spop %1729  ;;  %v1630_v52 = vstv %s2730_s28 }
 0xaed   :  { %s1591_s5 = sadd.f32 %s1728_s30, %s1726_s29  ;;  %v1603_v2 = vstv %s1730_s4  ;;  %v1631_v11 = vsel %vm1629_vm11, %v1630_v52, 0.0 }
 0xaee   :  { %1885 = vrcp.f32 %v1603_v2  ;;  %v1615_v20 = vand.u32 2147483648, %v1603_v2  ;;  %v1613_v60 = vand.u32 2147483647, %v1603_v2  ;;  %vm1609_vm4 = vweird.f32 %v1603_v2 }
 0xaf0   :  { %v1616_v30 = vor.u32 1.1754944e-38, %v1615_v20  ;;  %vm1614_vm6 = vcmp.eq.f32.partialorder %v1613_v60, 8.507059e+37 }
 0xaf4   :  { %v1886_v16 = vpop.eup %1885 }
 0xaf5   :  { %v1605_v32 = vmul.f32 %v1886_v16, %v1603_v2  ;;  %vm1610_vm9 = vweird.f32 %v1886_v16 }
 0xaf6   :  { %vm1611_vm12 = vmor %vm1609_vm4, %vm1610_vm9 }
 0xaf7   :  { %v1606_v13 = vsub.f32 1.0, %v1605_v32 }
 0xaf9   :  { %v1607_v12 = vmul.f32 %v1886_v16, %v1606_v13 }
 0xafb   :  { %v1608_v38 = vadd.f32 %v1886_v16, %v1607_v12 }
 0xafd   :  { %v1612_v63 = vsel %vm1611_vm12, %v1886_v16, %v1608_v38 }
 0xafe   :  { %v1617_v41 = vsel %vm1614_vm6, %v1616_v30, %v1612_v63 }
 0xaff   :  { %1731 = vpush %v1617_v41 }
 0xb30   :  { %s1732_s6 = spop %1731 }
 0xb31   :  { %s1619_s7 = smul.f32 %s1732_s6, %s1591_s5 }
 0xb33   :  { %s1621_s8 = sadd.f32 %s1620_s3, %s1619_s7  ;;  %v1634_v48 = vstv %s1619_s7 }
 0xb34   :  { %v1635_v56 = vsel %vm1633_vm14, %v1634_v48, 0.0 }
 0xb35   :  { %v1623_v43 = vstv %s1621_s8 }
 0xb36   :  { %v1624_v37 = vsel %vm1622_vm10, %v1623_v43, 0.0 }
 0xb37   :  { %v1628_v9 = vadd.f32 %v1627_v45, %v1624_v37 }
 0xb39   :  { %v1632_v1 = vadd.f32 %v1631_v11, %v1628_v9 }
 0xb3b   :  { %v1636_v14 = vadd.f32 %v1635_v56, %v1632_v1 }
 0xb3d   :  { %1637 = vst [vmem:[%s2745_s2] sm:$0x1] %v1636_v14 }

</bundles_post_ra>
